<compile_context>
chip_gen: v7x
topology: tpu7x:2x2x1
jax: 0.10.0
libtpu: 0.0.40
codegen_flags: <defaults>
</compile_context>

<pallas_src>
import math

import jax
import jax.numpy as jnp
from jax import lax
from jax.experimental import pallas as pl
from jax.experimental.pallas import tpu as pltpu


def _make_agg_conv_kernel(k, p, H, W, Wp, HWp, groups, cin, cout):
    """Build the per-sample kernel closure over static geometry.

    Refs (per grid step b):
      x_ref     : (dim, H, W)      input dtype   raw (unpadded) sample
      w_ref     : (dim, k*k*cin)   bf16          per-sample tap-stacked weight slab
      b_ref     : (dim, 1)         f32           per-sample aggregated bias
      o_ref     : (dim, H, W)      out dtype     module output for the sample
      xflat_ref : (dim, L)         f32 scratch   zero-padded image, spatially flattened
    """

    def kernel(x_ref, w_ref, b_ref, o_ref, xflat_ref):
        # Zero the padded-flat buffer every step. (It is persistent per-core scratch, so
        # a pl.when(program_id == 0) init would be wrong under "parallel" grid semantics
        # on a megacore chip; the sweep is a few KiB of VMEM stores.)
        xflat_ref[...] = jnp.zeros_like(xflat_ref)

        # Scatter the unpadded rows into the padded-flat layout (VMEM-only copies):
        # padded row (h+p), columns p..p+W-1  ->  flat lane offset (h+p)*Wp + p.
        for h in range(H):
            off = (h + p) * Wp + p
            xflat_ref[:, off:off + W] = x_ref[:, h, :].astype(xflat_ref.dtype)

        # Per group: stack the k*k shifted lane-windows onto the contraction axis and
        # issue ONE MXU matmul with K = k*k*cin (bf16 operands, f32 MXU accumulate).
        # Tap (kh, kw) of the padded image == contiguous lane window starting at
        # s = kh*Wp + kw, because x_pad[oh+kh, ow+kw] == x_flat[(oh*Wp + ow) + s].
        group_acc = []
        for g in range(groups):
            r0 = g * cin
            taps = []
            for kh in range(k):
                for kw in range(k):
                    s = kh * Wp + kw
                    taps.append(xflat_ref[r0:r0 + cin, s:s + HWp])
            x_stack = jnp.concatenate(taps, axis=0).astype(jnp.bfloat16)   # (k*k*cin, HWp)
            o0 = g * cout
            acc = jnp.dot(w_ref[o0:o0 + cout, :], x_stack,
                          preferred_element_type=jnp.float32)              # (cout, HWp)
            group_acc.append(acc + b_ref[o0:o0 + cout, :])
        acc_all = jnp.concatenate(group_acc, axis=0)                        # (dim, HWp)

        # Drop the padded-width garbage columns while storing: output row oh lives at
        # lanes [oh*Wp, oh*Wp + W) of the padded-flat result. No post-kernel unpad pass.
        for oh in range(H):
            j = oh * Wp
            o_ref[:, oh, :] = acc_all[:, j:j + W].astype(o_ref.dtype)

    return kernel


def kernel_aggregation_forward(x, attention, weight, bias, *, groups, kernel_size):
    """Pallas TPU forward of KernelAggregation.

    x:         (B, dim, H, W) float32 (NCHW, like PyTorch)
    attention: (B, num_kernels)
    weight:    (num_kernels, dim, dim // groups, k, k)
    bias:      (num_kernels, dim) or None
    returns:   (B, dim, H, W)
    """
    B, dim, H, W = x.shape
    k = kernel_size
    assert k % 2 == 1, "padded-flat window trick assumes odd kernel_size, stride 1"
    p = k // 2
    cin = dim // groups
    cout = dim // groups
    Hp, Wp = H + 2 * p, W + 2 * p
    HWp = H * Wp                    # flattened output lane extent over the padded width
    L = Hp * Wp + 2 * p             # flat padded image + 2p tail so every tap window fits
    kk = k * k

    # ---- glue: per-sample aggregation of the weight bank (tiny vs the conv itself) ----
    w_per = jnp.einsum('bn,noikl->boikl', attention, weight,
                       precision=lax.Precision.HIGHEST)               # (B, dim, cin, k, k)
    # tap-major / cin-minor column ordering, matching the in-kernel x_stack rows
    w_t = (w_per.transpose(0, 1, 3, 4, 2)                             # (B, dim, k, k, cin)
                 .reshape(B, dim, kk * cin)
                 .astype(jnp.bfloat16))

    if bias is not None:
        b_per = jnp.dot(attention, bias, precision=lax.Precision.HIGHEST)   # (B, dim)
    else:
        b_per = jnp.zeros((B, dim), jnp.float32)
    b_t = b_per.astype(jnp.float32).reshape(B, dim, 1)

    # ---- explicit VMEM budget: double-buffered blocks + scratch + live-value headroom ----
    blk = 2 * (dim * H * W * x.dtype.itemsize      # x block
               + dim * kk * cin * 2                # weight slab (bf16)
               + dim * 4                           # bias
               + dim * H * W * 4)                  # output block
    scratch = dim * L * 4                          # padded-flat f32 scratch
    live = kk * cin * HWp * 2 + dim * HWp * 4      # x_stack + accumulator values
    vmem_limit = int(min(max(4 * (blk + scratch + live), 16 * 2**20), 48 * 2**20))

    out = pl.pallas_call(
        _make_agg_conv_kernel(k, p, H, W, Wp, HWp, groups, cin, cout),
        out_shape=jax.ShapeDtypeStruct((B, dim, H, W), x.dtype),
        grid_spec=pltpu.PrefetchScalarGridSpec(
            num_scalar_prefetch=0,
            grid=(B,),
            in_specs=[
                pl.BlockSpec((None, dim, H, W), lambda b: (b, 0, 0, 0)),
                pl.BlockSpec((None, dim, kk * cin), lambda b: (b, 0, 0)),
                pl.BlockSpec((None, dim, 1), lambda b: (b, 0, 0)),
            ],
            out_specs=pl.BlockSpec((None, dim, H, W), lambda b: (b, 0, 0, 0)),
            scratch_shapes=[pltpu.VMEM((dim, L), jnp.float32)],
        ),
        compiler_params=pltpu.CompilerParams(
            dimension_semantics=("parallel",),
            vmem_limit_bytes=vmem_limit),
    )(x, w_t, b_t)
    return out


def kernel_aggregation_reference(x, attention, weight, bias, *, groups, kernel_size,
                                 compute_dtype=jnp.bfloat16):
    """Pure-JAX replica of the PyTorch forward (grouped conv trick).

    Uses the same explicit bf16 operand quantization + f32 accumulation as the Pallas
    kernel so the comparison isolates structural correctness (padding, grouping, taps,
    bias, channel order)."""
    B, dim, H, W = x.shape
    k = kernel_size
    p = k // 2
    cin = dim // groups
    x_r = x.reshape(1, B * dim, H, W).astype(compute_dtype)
    w_per = jnp.einsum('bn,noikl->boikl', attention, weight,
                       precision=lax.Precision.HIGHEST).reshape(B * dim, cin, k, k)
    w_per = w_per.astype(compute_dtype)
    out = lax.conv_general_dilated(
        x_r, w_per, window_strides=(1, 1), padding=[(p, p), (p, p)],
        dimension_numbers=('NCHW', 'OIHW', 'NCHW'),
        feature_group_count=B * groups,
        preferred_element_type=jnp.float32)
    if bias is not None:
        b_per = jnp.dot(attention, bias, precision=lax.Precision.HIGHEST).reshape(-1)
        out = out + b_per[None, :, None, None]
    return out.reshape(B, dim, H, W).astype(x.dtype)


if __name__ == "__main__":
    B, dim, H, W = 2, 8, 16, 16
    groups, ksize, num_kernels = 2, 3, 4

    key = jax.random.PRNGKey(0)
    kx, ka, kw_, kb = jax.random.split(key, 4)

    x = jax.random.normal(kx, (B, dim, H, W), jnp.float32)
    attention = jax.nn.softmax(jax.random.normal(ka, (B, num_kernels), jnp.float32), axis=-1)

    # kaiming_uniform_ per kernel slice: bound = sqrt(6 / fan_in), fan_in = (dim//g)*k*k
    fan_in = (dim // groups) * ksize * ksize
    bound = math.sqrt(6.0 / fan_in)
    weight = jax.random.uniform(kw_, (num_kernels, dim, dim // groups, ksize, ksize),
                                jnp.float32, minval=-bound, maxval=bound)
    # module inits bias to zeros; use small deterministic random values to exercise the path
    bias = 0.1 * jax.random.normal(kb, (num_kernels, dim), jnp.float32)

    out = kernel_aggregation_forward(x, attention, weight, bias,
                                     groups=groups, kernel_size=ksize)
    out = jax.block_until_ready(out)

    ref = kernel_aggregation_reference(x, attention, weight, bias,
                                       groups=groups, kernel_size=ksize)
    assert out.shape == (B, dim, H, W)
    max_err = float(jnp.max(jnp.abs(out - ref)))
    assert bool(jnp.allclose(out, ref, atol=1e-2, rtol=1e-2)), max_err
    print("KERNEL_OK")
</pallas_src>

<mosaic_0001>
module attributes {stable_mosaic.version = 11 : i64} {
  func.func @kernel(%arg0: i32, %arg1: memref<1x8x16x16xf32, #tpu.memory_space<vmem>>, %arg2: memref<1x8x36xbf16, #tpu.memory_space<vmem>>, %arg3: memref<1x8x1xf32, #tpu.memory_space<vmem>>, %arg4: memref<1x8x16x16xf32, #tpu.memory_space<vmem>>, %arg5: memref<8x326xf32, #tpu.memory_space<vmem>>) attributes {dimension_semantics = [#tpu.dimension_semantics<parallel>], iteration_bounds = array<i64: 2>, scalar_prefetch = 0 : i64, scratch_operands = 1 : i64, tpu.core_type = #tpu.core_type<tc>, window_params = [{transform_indices = @transform_0, window_bounds = array<i64: 1, 8, 16, 16>}, {transform_indices = @transform_1, window_bounds = array<i64: 1, 8, 36>}, {transform_indices = @transform_2, window_bounds = array<i64: 1, 8, 1>}, {transform_indices = @transform_3, window_bounds = array<i64: 1, 8, 16, 16>}]} {
    %cst = arith.constant 0.000000e+00 : f32
    %0 = vector.broadcast %cst : f32 to vector<8x326xf32>
    %c0 = arith.constant 0 : index
    %c0_0 = arith.constant 0 : index
    %1 = vector.load %arg5[%c0, %c0_0] : memref<8x326xf32, #tpu.memory_space<vmem>>, vector<8x326xf32>
    tpu.vector_store %arg5[%c0, %c0_0], %0 {strides = array<i32>} : memref<8x326xf32, #tpu.memory_space<vmem>>, vector<8x326xf32>,
    %c0_1 = arith.constant 0 : index
    %c0_2 = arith.constant 0 : index
    %c0_3 = arith.constant 0 : index
    %c0_4 = arith.constant 0 : index
    %2 = vector.load %arg1[%c0_1, %c0_2, %c0_3, %c0_4] : memref<1x8x16x16xf32, #tpu.memory_space<vmem>>, vector<1x8x1x16xf32>
    %3 = vector.shape_cast %2 : vector<1x8x1x16xf32> to vector<8x16xf32>
    %c0_5 = arith.constant 0 : index
    %c19 = arith.constant 19 : index
    %4 = vector.load %arg5[%c0_5, %c19] : memref<8x326xf32, #tpu.memory_space<vmem>>, vector<8x16xf32>
    tpu.vector_store %arg5[%c0_5, %c19], %3 {strides = array<i32>} : memref<8x326xf32, #tpu.memory_space<vmem>>, vector<8x16xf32>,
    %c0_6 = arith.constant 0 : index
    %c0_7 = arith.constant 0 : index
    %c1 = arith.constant 1 : index
    %c0_8 = arith.constant 0 : index
    %5 = vector.load %arg1[%c0_6, %c0_7, %c1, %c0_8] : memref<1x8x16x16xf32, #tpu.memory_space<vmem>>, vector<1x8x1x16xf32>
    %6 = vector.shape_cast %5 : vector<1x8x1x16xf32> to vector<8x16xf32>
    %c0_9 = arith.constant 0 : index
    %c37 = arith.constant 37 : index
    %7 = vector.load %arg5[%c0_9, %c37] : memref<8x326xf32, #tpu.memory_space<vmem>>, vector<8x16xf32>
    tpu.vector_store %arg5[%c0_9, %c37], %6 {strides = array<i32>} : memref<8x326xf32, #tpu.memory_space<vmem>>, vector<8x16xf32>,
    %c0_10 = arith.constant 0 : index
    %c0_11 = arith.constant 0 : index
    %c2 = arith.constant 2 : index
    %c0_12 = arith.constant 0 : index
    %8 = vector.load %arg1[%c0_10, %c0_11, %c2, %c0_12] : memref<1x8x16x16xf32, #tpu.memory_space<vmem>>, vector<1x8x1x16xf32>
    %9 = vector.shape_cast %8 : vector<1x8x1x16xf32> to vector<8x16xf32>
    %c0_13 = arith.constant 0 : index
    %c55 = arith.constant 55 : index
    %10 = vector.load %arg5[%c0_13, %c55] : memref<8x326xf32, #tpu.memory_space<vmem>>, vector<8x16xf32>
    tpu.vector_store %arg5[%c0_13, %c55], %9 {strides = array<i32>} : memref<8x326xf32, #tpu.memory_space<vmem>>, vector<8x16xf32>,
    %c0_14 = arith.constant 0 : index
    %c0_15 = arith.constant 0 : index
    %c3 = arith.constant 3 : index
    %c0_16 = arith.constant 0 : index
    %11 = vector.load %arg1[%c0_14, %c0_15, %c3, %c0_16] : memref<1x8x16x16xf32, #tpu.memory_space<vmem>>, vector<1x8x1x16xf32>
    %12 = vector.shape_cast %11 : vector<1x8x1x16xf32> to vector<8x16xf32>
    %c0_17 = arith.constant 0 : index
    %c73 = arith.constant 73 : index
    %13 = vector.load %arg5[%c0_17, %c73] : memref<8x326xf32, #tpu.memory_space<vmem>>, vector<8x16xf32>
    tpu.vector_store %arg5[%c0_17, %c73], %12 {strides = array<i32>} : memref<8x326xf32, #tpu.memory_space<vmem>>, vector<8x16xf32>,
    %c0_18 = arith.constant 0 : index
    %c0_19 = arith.constant 0 : index
    %c4 = arith.constant 4 : index
    %c0_20 = arith.constant 0 : index
    %14 = vector.load %arg1[%c0_18, %c0_19, %c4, %c0_20] : memref<1x8x16x16xf32, #tpu.memory_space<vmem>>, vector<1x8x1x16xf32>
    %15 = vector.shape_cast %14 : vector<1x8x1x16xf32> to vector<8x16xf32>
    %c0_21 = arith.constant 0 : index
    %c91 = arith.constant 91 : index
    %16 = vector.load %arg5[%c0_21, %c91] : memref<8x326xf32, #tpu.memory_space<vmem>>, vector<8x16xf32>
    tpu.vector_store %arg5[%c0_21, %c91], %15 {strides = array<i32>} : memref<8x326xf32, #tpu.memory_space<vmem>>, vector<8x16xf32>,
    %c0_22 = arith.constant 0 : index
    %c0_23 = arith.constant 0 : index
    %c5 = arith.constant 5 : index
    %c0_24 = arith.constant 0 : index
    %17 = vector.load %arg1[%c0_22, %c0_23, %c5, %c0_24] : memref<1x8x16x16xf32, #tpu.memory_space<vmem>>, vector<1x8x1x16xf32>
    %18 = vector.shape_cast %17 : vector<1x8x1x16xf32> to vector<8x16xf32>
    %c0_25 = arith.constant 0 : index
    %c109 = arith.constant 109 : index
    %19 = vector.load %arg5[%c0_25, %c109] : memref<8x326xf32, #tpu.memory_space<vmem>>, vector<8x16xf32>
    tpu.vector_store %arg5[%c0_25, %c109], %18 {strides = array<i32>} : memref<8x326xf32, #tpu.memory_space<vmem>>, vector<8x16xf32>,
    %c0_26 = arith.constant 0 : index
    %c0_27 = arith.constant 0 : index
    %c6 = arith.constant 6 : index
    %c0_28 = arith.constant 0 : index
    %20 = vector.load %arg1[%c0_26, %c0_27, %c6, %c0_28] : memref<1x8x16x16xf32, #tpu.memory_space<vmem>>, vector<1x8x1x16xf32>
    %21 = vector.shape_cast %20 : vector<1x8x1x16xf32> to vector<8x16xf32>
    %c0_29 = arith.constant 0 : index
    %c127 = arith.constant 127 : index
    %22 = vector.load %arg5[%c0_29, %c127] : memref<8x326xf32, #tpu.memory_space<vmem>>, vector<8x16xf32>
    tpu.vector_store %arg5[%c0_29, %c127], %21 {strides = array<i32>} : memref<8x326xf32, #tpu.memory_space<vmem>>, vector<8x16xf32>,
    %c0_30 = arith.constant 0 : index
    %c0_31 = arith.constant 0 : index
    %c7 = arith.constant 7 : index
    %c0_32 = arith.constant 0 : index
    %23 = vector.load %arg1[%c0_30, %c0_31, %c7, %c0_32] : memref<1x8x16x16xf32, #tpu.memory_space<vmem>>, vector<1x8x1x16xf32>
    %24 = vector.shape_cast %23 : vector<1x8x1x16xf32> to vector<8x16xf32>
    %c0_33 = arith.constant 0 : index
    %c145 = arith.constant 145 : index
    %25 = vector.load %arg5[%c0_33, %c145] : memref<8x326xf32, #tpu.memory_space<vmem>>, vector<8x16xf32>
    tpu.vector_store %arg5[%c0_33, %c145], %24 {strides = array<i32>} : memref<8x326xf32, #tpu.memory_space<vmem>>, vector<8x16xf32>,
    %c0_34 = arith.constant 0 : index
    %c0_35 = arith.constant 0 : index
    %c8 = arith.constant 8 : index
    %c0_36 = arith.constant 0 : index
    %26 = vector.load %arg1[%c0_34, %c0_35, %c8, %c0_36] : memref<1x8x16x16xf32, #tpu.memory_space<vmem>>, vector<1x8x1x16xf32>
    %27 = vector.shape_cast %26 : vector<1x8x1x16xf32> to vector<8x16xf32>
    %c0_37 = arith.constant 0 : index
    %c163 = arith.constant 163 : index
    %28 = vector.load %arg5[%c0_37, %c163] : memref<8x326xf32, #tpu.memory_space<vmem>>, vector<8x16xf32>
    tpu.vector_store %arg5[%c0_37, %c163], %27 {strides = array<i32>} : memref<8x326xf32, #tpu.memory_space<vmem>>, vector<8x16xf32>,
    %c0_38 = arith.constant 0 : index
    %c0_39 = arith.constant 0 : index
    %c9 = arith.constant 9 : index
    %c0_40 = arith.constant 0 : index
    %29 = vector.load %arg1[%c0_38, %c0_39, %c9, %c0_40] : memref<1x8x16x16xf32, #tpu.memory_space<vmem>>, vector<1x8x1x16xf32>
    %30 = vector.shape_cast %29 : vector<1x8x1x16xf32> to vector<8x16xf32>
    %c0_41 = arith.constant 0 : index
    %c181 = arith.constant 181 : index
    %31 = vector.load %arg5[%c0_41, %c181] : memref<8x326xf32, #tpu.memory_space<vmem>>, vector<8x16xf32>
    tpu.vector_store %arg5[%c0_41, %c181], %30 {strides = array<i32>} : memref<8x326xf32, #tpu.memory_space<vmem>>, vector<8x16xf32>,
    %c0_42 = arith.constant 0 : index
    %c0_43 = arith.constant 0 : index
    %c10 = arith.constant 10 : index
    %c0_44 = arith.constant 0 : index
    %32 = vector.load %arg1[%c0_42, %c0_43, %c10, %c0_44] : memref<1x8x16x16xf32, #tpu.memory_space<vmem>>, vector<1x8x1x16xf32>
    %33 = vector.shape_cast %32 : vector<1x8x1x16xf32> to vector<8x16xf32>
    %c0_45 = arith.constant 0 : index
    %c199 = arith.constant 199 : index
    %34 = vector.load %arg5[%c0_45, %c199] : memref<8x326xf32, #tpu.memory_space<vmem>>, vector<8x16xf32>
    tpu.vector_store %arg5[%c0_45, %c199], %33 {strides = array<i32>} : memref<8x326xf32, #tpu.memory_space<vmem>>, vector<8x16xf32>,
    %c0_46 = arith.constant 0 : index
    %c0_47 = arith.constant 0 : index
    %c11 = arith.constant 11 : index
    %c0_48 = arith.constant 0 : index
    %35 = vector.load %arg1[%c0_46, %c0_47, %c11, %c0_48] : memref<1x8x16x16xf32, #tpu.memory_space<vmem>>, vector<1x8x1x16xf32>
    %36 = vector.shape_cast %35 : vector<1x8x1x16xf32> to vector<8x16xf32>
    %c0_49 = arith.constant 0 : index
    %c217 = arith.constant 217 : index
    %37 = vector.load %arg5[%c0_49, %c217] : memref<8x326xf32, #tpu.memory_space<vmem>>, vector<8x16xf32>
    tpu.vector_store %arg5[%c0_49, %c217], %36 {strides = array<i32>} : memref<8x326xf32, #tpu.memory_space<vmem>>, vector<8x16xf32>,
    %c0_50 = arith.constant 0 : index
    %c0_51 = arith.constant 0 : index
    %c12 = arith.constant 12 : index
    %c0_52 = arith.constant 0 : index
    %38 = vector.load %arg1[%c0_50, %c0_51, %c12, %c0_52] : memref<1x8x16x16xf32, #tpu.memory_space<vmem>>, vector<1x8x1x16xf32>
    %39 = vector.shape_cast %38 : vector<1x8x1x16xf32> to vector<8x16xf32>
    %c0_53 = arith.constant 0 : index
    %c235 = arith.constant 235 : index
    %40 = vector.load %arg5[%c0_53, %c235] : memref<8x326xf32, #tpu.memory_space<vmem>>, vector<8x16xf32>
    tpu.vector_store %arg5[%c0_53, %c235], %39 {strides = array<i32>} : memref<8x326xf32, #tpu.memory_space<vmem>>, vector<8x16xf32>,
    %c0_54 = arith.constant 0 : index
    %c0_55 = arith.constant 0 : index
    %c13 = arith.constant 13 : index
    %c0_56 = arith.constant 0 : index
    %41 = vector.load %arg1[%c0_54, %c0_55, %c13, %c0_56] : memref<1x8x16x16xf32, #tpu.memory_space<vmem>>, vector<1x8x1x16xf32>
    %42 = vector.shape_cast %41 : vector<1x8x1x16xf32> to vector<8x16xf32>
    %c0_57 = arith.constant 0 : index
    %c253 = arith.constant 253 : index
    %43 = vector.load %arg5[%c0_57, %c253] : memref<8x326xf32, #tpu.memory_space<vmem>>, vector<8x16xf32>
    tpu.vector_store %arg5[%c0_57, %c253], %42 {strides = array<i32>} : memref<8x326xf32, #tpu.memory_space<vmem>>, vector<8x16xf32>,
    %c0_58 = arith.constant 0 : index
    %c0_59 = arith.constant 0 : index
    %c14 = arith.constant 14 : index
    %c0_60 = arith.constant 0 : index
    %44 = vector.load %arg1[%c0_58, %c0_59, %c14, %c0_60] : memref<1x8x16x16xf32, #tpu.memory_space<vmem>>, vector<1x8x1x16xf32>
    %45 = vector.shape_cast %44 : vector<1x8x1x16xf32> to vector<8x16xf32>
    %c0_61 = arith.constant 0 : index
    %c271 = arith.constant 271 : index
    %46 = vector.load %arg5[%c0_61, %c271] : memref<8x326xf32, #tpu.memory_space<vmem>>, vector<8x16xf32>
    tpu.vector_store %arg5[%c0_61, %c271], %45 {strides = array<i32>} : memref<8x326xf32, #tpu.memory_space<vmem>>, vector<8x16xf32>,
    %c0_62 = arith.constant 0 : index
    %c0_63 = arith.constant 0 : index
    %c15 = arith.constant 15 : index
    %c0_64 = arith.constant 0 : index
    %47 = vector.load %arg1[%c0_62, %c0_63, %c15, %c0_64] : memref<1x8x16x16xf32, #tpu.memory_space<vmem>>, vector<1x8x1x16xf32>
    %48 = vector.shape_cast %47 : vector<1x8x1x16xf32> to vector<8x16xf32>
    %c0_65 = arith.constant 0 : index
    %c289 = arith.constant 289 : index
    %49 = vector.load %arg5[%c0_65, %c289] : memref<8x326xf32, #tpu.memory_space<vmem>>, vector<8x16xf32>
    tpu.vector_store %arg5[%c0_65, %c289], %48 {strides = array<i32>} : memref<8x326xf32, #tpu.memory_space<vmem>>, vector<8x16xf32>,
    %c0_66 = arith.constant 0 : index
    %c0_67 = arith.constant 0 : index
    %50 = vector.load %arg5[%c0_66, %c0_67] : memref<8x326xf32, #tpu.memory_space<vmem>>, vector<4x288xf32>
    %c0_68 = arith.constant 0 : index
    %c1_69 = arith.constant 1 : index
    %51 = vector.load %arg5[%c0_68, %c1_69] : memref<8x326xf32, #tpu.memory_space<vmem>>, vector<4x288xf32>
    %c0_70 = arith.constant 0 : index
    %c2_71 = arith.constant 2 : index
    %52 = vector.load %arg5[%c0_70, %c2_71] : memref<8x326xf32, #tpu.memory_space<vmem>>, vector<4x288xf32>
    %c0_72 = arith.constant 0 : index
    %c18 = arith.constant 18 : index
    %53 = vector.load %arg5[%c0_72, %c18] : memref<8x326xf32, #tpu.memory_space<vmem>>, vector<4x288xf32>
    %c0_73 = arith.constant 0 : index
    %c19_74 = arith.constant 19 : index
    %54 = vector.load %arg5[%c0_73, %c19_74] : memref<8x326xf32, #tpu.memory_space<vmem>>, vector<4x288xf32>
    %c0_75 = arith.constant 0 : index
    %c20 = arith.constant 20 : index
    %55 = vector.load %arg5[%c0_75, %c20] : memref<8x326xf32, #tpu.memory_space<vmem>>, vector<4x288xf32>
    %c0_76 = arith.constant 0 : index
    %c36 = arith.constant 36 : index
    %56 = vector.load %arg5[%c0_76, %c36] : memref<8x326xf32, #tpu.memory_space<vmem>>, vector<4x288xf32>
    %c0_77 = arith.constant 0 : index
    %c37_78 = arith.constant 37 : index
    %57 = vector.load %arg5[%c0_77, %c37_78] : memref<8x326xf32, #tpu.memory_space<vmem>>, vector<4x288xf32>
    %c0_79 = arith.constant 0 : index
    %c38 = arith.constant 38 : index
    %58 = vector.load %arg5[%c0_79, %c38] : memref<8x326xf32, #tpu.memory_space<vmem>>, vector<4x288xf32>
    %59 = tpu.concatenate %50, %51, %52, %53, %54, %55, %56, %57, %58 in 0 : vector<4x288xf32>, vector<4x288xf32>, vector<4x288xf32>, vector<4x288xf32>, vector<4x288xf32>, vector<4x288xf32>, vector<4x288xf32>, vector<4x288xf32>, vector<4x288xf32> -> vector<36x288xf32>
    %60 = arith.truncf %59 : vector<36x288xf32> to vector<36x288xbf16>
    %c0_80 = arith.constant 0 : index
    %c0_81 = arith.constant 0 : index
    %c0_82 = arith.constant 0 : index
    %61 = vector.load %arg2[%c0_80, %c0_81, %c0_82] : memref<1x8x36xbf16, #tpu.memory_space<vmem>>, vector<1x4x36xbf16>
    %62 = vector.shape_cast %61 : vector<1x4x36xbf16> to vector<4x36xbf16>
    %cst_83 = arith.constant dense<0.000000e+00> : vector<4x288xf32>
    %63 = tpu.matmul %62, %60, %cst_83 {dimension_numbers = #tpu.dot_dimension_numbers<[1], [0], [0], [1], [0, 0, 1, 1], [], []>} : vector<4x36xbf16>, vector<36x288xbf16>, vector<4x288xf32> -> vector<4x288xf32>
    %c0_84 = arith.constant 0 : index
    %c0_85 = arith.constant 0 : index
    %c0_86 = arith.constant 0 : index
    %64 = vector.load %arg3[%c0_84, %c0_85, %c0_86] : memref<1x8x1xf32, #tpu.memory_space<vmem>>, vector<1x4x1xf32>
    %65 = vector.shape_cast %64 : vector<1x4x1xf32> to vector<4x1xf32>
    %66 = vector.broadcast %65 : vector<4x1xf32> to vector<4x288xf32>
    %67 = arith.addf %63, %66 : vector<4x288xf32>
    %c4_87 = arith.constant 4 : index
    %c0_88 = arith.constant 0 : index
    %68 = vector.load %arg5[%c4_87, %c0_88] : memref<8x326xf32, #tpu.memory_space<vmem>>, vector<4x288xf32>
    %c4_89 = arith.constant 4 : index
    %c1_90 = arith.constant 1 : index
    %69 = vector.load %arg5[%c4_89, %c1_90] : memref<8x326xf32, #tpu.memory_space<vmem>>, vector<4x288xf32>
    %c4_91 = arith.constant 4 : index
    %c2_92 = arith.constant 2 : index
    %70 = vector.load %arg5[%c4_91, %c2_92] : memref<8x326xf32, #tpu.memory_space<vmem>>, vector<4x288xf32>
    %c4_93 = arith.constant 4 : index
    %c18_94 = arith.constant 18 : index
    %71 = vector.load %arg5[%c4_93, %c18_94] : memref<8x326xf32, #tpu.memory_space<vmem>>, vector<4x288xf32>
    %c4_95 = arith.constant 4 : index
    %c19_96 = arith.constant 19 : index
    %72 = vector.load %arg5[%c4_95, %c19_96] : memref<8x326xf32, #tpu.memory_space<vmem>>, vector<4x288xf32>
    %c4_97 = arith.constant 4 : index
    %c20_98 = arith.constant 20 : index
    %73 = vector.load %arg5[%c4_97, %c20_98] : memref<8x326xf32, #tpu.memory_space<vmem>>, vector<4x288xf32>
    %c4_99 = arith.constant 4 : index
    %c36_100 = arith.constant 36 : index
    %74 = vector.load %arg5[%c4_99, %c36_100] : memref<8x326xf32, #tpu.memory_space<vmem>>, vector<4x288xf32>
    %c4_101 = arith.constant 4 : index
    %c37_102 = arith.constant 37 : index
    %75 = vector.load %arg5[%c4_101, %c37_102] : memref<8x326xf32, #tpu.memory_space<vmem>>, vector<4x288xf32>
    %c4_103 = arith.constant 4 : index
    %c38_104 = arith.constant 38 : index
    %76 = vector.load %arg5[%c4_103, %c38_104] : memref<8x326xf32, #tpu.memory_space<vmem>>, vector<4x288xf32>
    %77 = tpu.concatenate %68, %69, %70, %71, %72, %73, %74, %75, %76 in 0 : vector<4x288xf32>, vector<4x288xf32>, vector<4x288xf32>, vector<4x288xf32>, vector<4x288xf32>, vector<4x288xf32>, vector<4x288xf32>, vector<4x288xf32>, vector<4x288xf32> -> vector<36x288xf32>
    %78 = arith.truncf %77 : vector<36x288xf32> to vector<36x288xbf16>
    %c0_105 = arith.constant 0 : index
    %c4_106 = arith.constant 4 : index
    %c0_107 = arith.constant 0 : index
    %79 = vector.load %arg2[%c0_105, %c4_106, %c0_107] : memref<1x8x36xbf16, #tpu.memory_space<vmem>>, vector<1x4x36xbf16>
    %80 = vector.shape_cast %79 : vector<1x4x36xbf16> to vector<4x36xbf16>
    %cst_108 = arith.constant dense<0.000000e+00> : vector<4x288xf32>
    %81 = tpu.matmul %80, %78, %cst_108 {dimension_numbers = #tpu.dot_dimension_numbers<[1], [0], [0], [1], [0, 0, 1, 1], [], []>} : vector<4x36xbf16>, vector<36x288xbf16>, vector<4x288xf32> -> vector<4x288xf32>
    %c0_109 = arith.constant 0 : index
    %c4_110 = arith.constant 4 : index
    %c0_111 = arith.constant 0 : index
    %82 = vector.load %arg3[%c0_109, %c4_110, %c0_111] : memref<1x8x1xf32, #tpu.memory_space<vmem>>, vector<1x4x1xf32>
    %83 = vector.shape_cast %82 : vector<1x4x1xf32> to vector<4x1xf32>
    %84 = vector.broadcast %83 : vector<4x1xf32> to vector<4x288xf32>
    %85 = arith.addf %81, %84 : vector<4x288xf32>
    %86 = tpu.concatenate %67, %85 in 0 : vector<4x288xf32>, vector<4x288xf32> -> vector<8x288xf32>
    %87 = vector.extract_strided_slice %86 {offsets = [0, 0], sizes = [8, 16], strides = [1, 1]} : vector<8x288xf32> to vector<8x16xf32>
    %c0_112 = arith.constant 0 : index
    %c0_113 = arith.constant 0 : index
    %c0_114 = arith.constant 0 : index
    %c0_115 = arith.constant 0 : index
    %88 = vector.load %arg4[%c0_112, %c0_113, %c0_114, %c0_115] : memref<1x8x16x16xf32, #tpu.memory_space<vmem>>, vector<1x8x1x16xf32>
    %89 = vector.shape_cast %88 : vector<1x8x1x16xf32> to vector<8x16xf32>
    %90 = vector.shape_cast %87 : vector<8x16xf32> to vector<1x8x1x16xf32>
    tpu.vector_store %arg4[%c0_112, %c0_113, %c0_114, %c0_115], %90 {strides = array<i32>} : memref<1x8x16x16xf32, #tpu.memory_space<vmem>>, vector<1x8x1x16xf32>,
    %91 = vector.extract_strided_slice %86 {offsets = [0, 18], sizes = [8, 16], strides = [1, 1]} : vector<8x288xf32> to vector<8x16xf32>
    %c0_116 = arith.constant 0 : index
    %c0_117 = arith.constant 0 : index
    %c1_118 = arith.constant 1 : index
    %c0_119 = arith.constant 0 : index
    %92 = vector.load %arg4[%c0_116, %c0_117, %c1_118, %c0_119] : memref<1x8x16x16xf32, #tpu.memory_space<vmem>>, vector<1x8x1x16xf32>
    %93 = vector.shape_cast %92 : vector<1x8x1x16xf32> to vector<8x16xf32>
    %94 = vector.shape_cast %91 : vector<8x16xf32> to vector<1x8x1x16xf32>
    tpu.vector_store %arg4[%c0_116, %c0_117, %c1_118, %c0_119], %94 {strides = array<i32>} : memref<1x8x16x16xf32, #tpu.memory_space<vmem>>, vector<1x8x1x16xf32>,
    %95 = vector.extract_strided_slice %86 {offsets = [0, 36], sizes = [8, 16], strides = [1, 1]} : vector<8x288xf32> to vector<8x16xf32>
    %c0_120 = arith.constant 0 : index
    %c0_121 = arith.constant 0 : index
    %c2_122 = arith.constant 2 : index
    %c0_123 = arith.constant 0 : index
    %96 = vector.load %arg4[%c0_120, %c0_121, %c2_122, %c0_123] : memref<1x8x16x16xf32, #tpu.memory_space<vmem>>, vector<1x8x1x16xf32>
    %97 = vector.shape_cast %96 : vector<1x8x1x16xf32> to vector<8x16xf32>
    %98 = vector.shape_cast %95 : vector<8x16xf32> to vector<1x8x1x16xf32>
    tpu.vector_store %arg4[%c0_120, %c0_121, %c2_122, %c0_123], %98 {strides = array<i32>} : memref<1x8x16x16xf32, #tpu.memory_space<vmem>>, vector<1x8x1x16xf32>,
    %99 = vector.extract_strided_slice %86 {offsets = [0, 54], sizes = [8, 16], strides = [1, 1]} : vector<8x288xf32> to vector<8x16xf32>
    %c0_124 = arith.constant 0 : index
    %c0_125 = arith.constant 0 : index
    %c3_126 = arith.constant 3 : index
    %c0_127 = arith.constant 0 : index
    %100 = vector.load %arg4[%c0_124, %c0_125, %c3_126, %c0_127] : memref<1x8x16x16xf32, #tpu.memory_space<vmem>>, vector<1x8x1x16xf32>
    %101 = vector.shape_cast %100 : vector<1x8x1x16xf32> to vector<8x16xf32>
    %102 = vector.shape_cast %99 : vector<8x16xf32> to vector<1x8x1x16xf32>
    tpu.vector_store %arg4[%c0_124, %c0_125, %c3_126, %c0_127], %102 {strides = array<i32>} : memref<1x8x16x16xf32, #tpu.memory_space<vmem>>, vector<1x8x1x16xf32>,
    %103 = vector.extract_strided_slice %86 {offsets = [0, 72], sizes = [8, 16], strides = [1, 1]} : vector<8x288xf32> to vector<8x16xf32>
    %c0_128 = arith.constant 0 : index
    %c0_129 = arith.constant 0 : index
    %c4_130 = arith.constant 4 : index
    %c0_131 = arith.constant 0 : index
    %104 = vector.load %arg4[%c0_128, %c0_129, %c4_130, %c0_131] : memref<1x8x16x16xf32, #tpu.memory_space<vmem>>, vector<1x8x1x16xf32>
    %105 = vector.shape_cast %104 : vector<1x8x1x16xf32> to vector<8x16xf32>
    %106 = vector.shape_cast %103 : vector<8x16xf32> to vector<1x8x1x16xf32>
    tpu.vector_store %arg4[%c0_128, %c0_129, %c4_130, %c0_131], %106 {strides = array<i32>} : memref<1x8x16x16xf32, #tpu.memory_space<vmem>>, vector<1x8x1x16xf32>,
    %107 = vector.extract_strided_slice %86 {offsets = [0, 90], sizes = [8, 16], strides = [1, 1]} : vector<8x288xf32> to vector<8x16xf32>
    %c0_132 = arith.constant 0 : index
    %c0_133 = arith.constant 0 : index
    %c5_134 = arith.constant 5 : index
    %c0_135 = arith.constant 0 : index
    %108 = vector.load %arg4[%c0_132, %c0_133, %c5_134, %c0_135] : memref<1x8x16x16xf32, #tpu.memory_space<vmem>>, vector<1x8x1x16xf32>
    %109 = vector.shape_cast %108 : vector<1x8x1x16xf32> to vector<8x16xf32>
    %110 = vector.shape_cast %107 : vector<8x16xf32> to vector<1x8x1x16xf32>
    tpu.vector_store %arg4[%c0_132, %c0_133, %c5_134, %c0_135], %110 {strides = array<i32>} : memref<1x8x16x16xf32, #tpu.memory_space<vmem>>, vector<1x8x1x16xf32>,
    %111 = vector.extract_strided_slice %86 {offsets = [0, 108], sizes = [8, 16], strides = [1, 1]} : vector<8x288xf32> to vector<8x16xf32>
    %c0_136 = arith.constant 0 : index
    %c0_137 = arith.constant 0 : index
    %c6_138 = arith.constant 6 : index
    %c0_139 = arith.constant 0 : index
    %112 = vector.load %arg4[%c0_136, %c0_137, %c6_138, %c0_139] : memref<1x8x16x16xf32, #tpu.memory_space<vmem>>, vector<1x8x1x16xf32>
    %113 = vector.shape_cast %112 : vector<1x8x1x16xf32> to vector<8x16xf32>
    %114 = vector.shape_cast %111 : vector<8x16xf32> to vector<1x8x1x16xf32>
    tpu.vector_store %arg4[%c0_136, %c0_137, %c6_138, %c0_139], %114 {strides = array<i32>} : memref<1x8x16x16xf32, #tpu.memory_space<vmem>>, vector<1x8x1x16xf32>,
    %115 = vector.extract_strided_slice %86 {offsets = [0, 126], sizes = [8, 16], strides = [1, 1]} : vector<8x288xf32> to vector<8x16xf32>
    %c0_140 = arith.constant 0 : index
    %c0_141 = arith.constant 0 : index
    %c7_142 = arith.constant 7 : index
    %c0_143 = arith.constant 0 : index
    %116 = vector.load %arg4[%c0_140, %c0_141, %c7_142, %c0_143] : memref<1x8x16x16xf32, #tpu.memory_space<vmem>>, vector<1x8x1x16xf32>
    %117 = vector.shape_cast %116 : vector<1x8x1x16xf32> to vector<8x16xf32>
    %118 = vector.shape_cast %115 : vector<8x16xf32> to vector<1x8x1x16xf32>
    tpu.vector_store %arg4[%c0_140, %c0_141, %c7_142, %c0_143], %118 {strides = array<i32>} : memref<1x8x16x16xf32, #tpu.memory_space<vmem>>, vector<1x8x1x16xf32>,
    %119 = vector.extract_strided_slice %86 {offsets = [0, 144], sizes = [8, 16], strides = [1, 1]} : vector<8x288xf32> to vector<8x16xf32>
    %c0_144 = arith.constant 0 : index
    %c0_145 = arith.constant 0 : index
    %c8_146 = arith.constant 8 : index
    %c0_147 = arith.constant 0 : index
    %120 = vector.load %arg4[%c0_144, %c0_145, %c8_146, %c0_147] : memref<1x8x16x16xf32, #tpu.memory_space<vmem>>, vector<1x8x1x16xf32>
    %121 = vector.shape_cast %120 : vector<1x8x1x16xf32> to vector<8x16xf32>
    %122 = vector.shape_cast %119 : vector<8x16xf32> to vector<1x8x1x16xf32>
    tpu.vector_store %arg4[%c0_144, %c0_145, %c8_146, %c0_147], %122 {strides = array<i32>} : memref<1x8x16x16xf32, #tpu.memory_space<vmem>>, vector<1x8x1x16xf32>,
    %123 = vector.extract_strided_slice %86 {offsets = [0, 162], sizes = [8, 16], strides = [1, 1]} : vector<8x288xf32> to vector<8x16xf32>
    %c0_148 = arith.constant 0 : index
    %c0_149 = arith.constant 0 : index
    %c9_150 = arith.constant 9 : index
    %c0_151 = arith.constant 0 : index
    %124 = vector.load %arg4[%c0_148, %c0_149, %c9_150, %c0_151] : memref<1x8x16x16xf32, #tpu.memory_space<vmem>>, vector<1x8x1x16xf32>
    %125 = vector.shape_cast %124 : vector<1x8x1x16xf32> to vector<8x16xf32>
    %126 = vector.shape_cast %123 : vector<8x16xf32> to vector<1x8x1x16xf32>
    tpu.vector_store %arg4[%c0_148, %c0_149, %c9_150, %c0_151], %126 {strides = array<i32>} : memref<1x8x16x16xf32, #tpu.memory_space<vmem>>, vector<1x8x1x16xf32>,
    %127 = vector.extract_strided_slice %86 {offsets = [0, 180], sizes = [8, 16], strides = [1, 1]} : vector<8x288xf32> to vector<8x16xf32>
    %c0_152 = arith.constant 0 : index
    %c0_153 = arith.constant 0 : index
    %c10_154 = arith.constant 10 : index
    %c0_155 = arith.constant 0 : index
    %128 = vector.load %arg4[%c0_152, %c0_153, %c10_154, %c0_155] : memref<1x8x16x16xf32, #tpu.memory_space<vmem>>, vector<1x8x1x16xf32>
    %129 = vector.shape_cast %128 : vector<1x8x1x16xf32> to vector<8x16xf32>
    %130 = vector.shape_cast %127 : vector<8x16xf32> to vector<1x8x1x16xf32>
    tpu.vector_store %arg4[%c0_152, %c0_153, %c10_154, %c0_155], %130 {strides = array<i32>} : memref<1x8x16x16xf32, #tpu.memory_space<vmem>>, vector<1x8x1x16xf32>,
    %131 = vector.extract_strided_slice %86 {offsets = [0, 198], sizes = [8, 16], strides = [1, 1]} : vector<8x288xf32> to vector<8x16xf32>
    %c0_156 = arith.constant 0 : index
    %c0_157 = arith.constant 0 : index
    %c11_158 = arith.constant 11 : index
    %c0_159 = arith.constant 0 : index
    %132 = vector.load %arg4[%c0_156, %c0_157, %c11_158, %c0_159] : memref<1x8x16x16xf32, #tpu.memory_space<vmem>>, vector<1x8x1x16xf32>
    %133 = vector.shape_cast %132 : vector<1x8x1x16xf32> to vector<8x16xf32>
    %134 = vector.shape_cast %131 : vector<8x16xf32> to vector<1x8x1x16xf32>
    tpu.vector_store %arg4[%c0_156, %c0_157, %c11_158, %c0_159], %134 {strides = array<i32>} : memref<1x8x16x16xf32, #tpu.memory_space<vmem>>, vector<1x8x1x16xf32>,
    %135 = vector.extract_strided_slice %86 {offsets = [0, 216], sizes = [8, 16], strides = [1, 1]} : vector<8x288xf32> to vector<8x16xf32>
    %c0_160 = arith.constant 0 : index
    %c0_161 = arith.constant 0 : index
    %c12_162 = arith.constant 12 : index
    %c0_163 = arith.constant 0 : index
    %136 = vector.load %arg4[%c0_160, %c0_161, %c12_162, %c0_163] : memref<1x8x16x16xf32, #tpu.memory_space<vmem>>, vector<1x8x1x16xf32>
    %137 = vector.shape_cast %136 : vector<1x8x1x16xf32> to vector<8x16xf32>
    %138 = vector.shape_cast %135 : vector<8x16xf32> to vector<1x8x1x16xf32>
    tpu.vector_store %arg4[%c0_160, %c0_161, %c12_162, %c0_163], %138 {strides = array<i32>} : memref<1x8x16x16xf32, #tpu.memory_space<vmem>>, vector<1x8x1x16xf32>,
    %139 = vector.extract_strided_slice %86 {offsets = [0, 234], sizes = [8, 16], strides = [1, 1]} : vector<8x288xf32> to vector<8x16xf32>
    %c0_164 = arith.constant 0 : index
    %c0_165 = arith.constant 0 : index
    %c13_166 = arith.constant 13 : index
    %c0_167 = arith.constant 0 : index
    %140 = vector.load %arg4[%c0_164, %c0_165, %c13_166, %c0_167] : memref<1x8x16x16xf32, #tpu.memory_space<vmem>>, vector<1x8x1x16xf32>
    %141 = vector.shape_cast %140 : vector<1x8x1x16xf32> to vector<8x16xf32>
    %142 = vector.shape_cast %139 : vector<8x16xf32> to vector<1x8x1x16xf32>
    tpu.vector_store %arg4[%c0_164, %c0_165, %c13_166, %c0_167], %142 {strides = array<i32>} : memref<1x8x16x16xf32, #tpu.memory_space<vmem>>, vector<1x8x1x16xf32>,
    %143 = vector.extract_strided_slice %86 {offsets = [0, 252], sizes = [8, 16], strides = [1, 1]} : vector<8x288xf32> to vector<8x16xf32>
    %c0_168 = arith.constant 0 : index
    %c0_169 = arith.constant 0 : index
    %c14_170 = arith.constant 14 : index
    %c0_171 = arith.constant 0 : index
    %144 = vector.load %arg4[%c0_168, %c0_169, %c14_170, %c0_171] : memref<1x8x16x16xf32, #tpu.memory_space<vmem>>, vector<1x8x1x16xf32>
    %145 = vector.shape_cast %144 : vector<1x8x1x16xf32> to vector<8x16xf32>
    %146 = vector.shape_cast %143 : vector<8x16xf32> to vector<1x8x1x16xf32>
    tpu.vector_store %arg4[%c0_168, %c0_169, %c14_170, %c0_171], %146 {strides = array<i32>} : memref<1x8x16x16xf32, #tpu.memory_space<vmem>>, vector<1x8x1x16xf32>,
    %147 = vector.extract_strided_slice %86 {offsets = [0, 270], sizes = [8, 16], strides = [1, 1]} : vector<8x288xf32> to vector<8x16xf32>
    %c0_172 = arith.constant 0 : index
    %c0_173 = arith.constant 0 : index
    %c15_174 = arith.constant 15 : index
    %c0_175 = arith.constant 0 : index
    %148 = vector.load %arg4[%c0_172, %c0_173, %c15_174, %c0_175] : memref<1x8x16x16xf32, #tpu.memory_space<vmem>>, vector<1x8x1x16xf32>
    %149 = vector.shape_cast %148 : vector<1x8x1x16xf32> to vector<8x16xf32>
    %150 = vector.shape_cast %147 : vector<8x16xf32> to vector<1x8x1x16xf32>
    tpu.vector_store %arg4[%c0_172, %c0_173, %c15_174, %c0_175], %150 {strides = array<i32>} : memref<1x8x16x16xf32, #tpu.memory_space<vmem>>, vector<1x8x1x16xf32>,
    return
  }
  func.func @transform_0(%arg0: i32) -> (i32, i32, i32, i32) {
    %c0_i32 = arith.constant 0 : i32
    %c0_i32_0 = arith.constant 0 : i32
    %c0_i32_1 = arith.constant 0 : i32
    %c0_i32_2 = arith.constant 0 : i32
    return %arg0, %c0_i32, %c0_i32_0, %c0_i32_1 : i32, i32, i32, i32
  }
  func.func @transform_1(%arg0: i32) -> (i32, i32, i32) {
    %c0_i32 = arith.constant 0 : i32
    %c0_i32_0 = arith.constant 0 : i32
    %c0_i32_1 = arith.constant 0 : i32
    return %arg0, %c0_i32, %c0_i32_0 : i32, i32, i32
  }
  func.func @transform_2(%arg0: i32) -> (i32, i32, i32) {
    %c0_i32 = arith.constant 0 : i32
    %c0_i32_0 = arith.constant 0 : i32
    %c0_i32_1 = arith.constant 0 : i32
    return %arg0, %c0_i32, %c0_i32_0 : i32, i32, i32
  }
  func.func @transform_3(%arg0: i32) -> (i32, i32, i32, i32) {
    %c0_i32 = arith.constant 0 : i32
    %c0_i32_0 = arith.constant 0 : i32
    %c0_i32_1 = arith.constant 0 : i32
    %c0_i32_2 = arith.constant 0 : i32
    return %arg0, %c0_i32, %c0_i32_0, %c0_i32_1 : i32, i32, i32, i32
  }
}

</mosaic_0001>

<bundles_post_ra>
// kernel: tpu_custom_call.1
= control target key start
LH: loop header
LB: loop body
LE: loop exit
PB: predicated region body
PF: predicated region fallthrough
CT: control target
= control target key end

     0   :  { %8 = vsyncpa [#allocation4], 0  ;;  %s4313_s0 = inlined_call_operand.hbm [shape: f32[2,8,16,16], index: 0, kind: input, shape index: {}]   ;;  %s4314_s1 = inlined_call_operand.vmem [shape: bf16[2,8,36], index: 1, kind: input, shape index: {}]   ;;  %s4315_s2 = inlined_call_operand.vmem [shape: f32[2,8,1], index: 2, kind: input, shape index: {}]   ;;  %s4316_s3 = inlined_call_operand.hbm [shape: f32[2,8,16,16], index: 3, kind: output, shape index: {}]  }
   0x1   :  { %10 = vsyncpa [#allocation4 + $0x1], 0 }
   0x2   :  { %11 = vsyncpa [#allocation5], 0 }
   0x3   :  { %13 = vsyncpa [#allocation5 + $0x1], 0  ;;  %s2818_s12 = smov 0   ;;  %s2820_s13 = smov 0  }
   0x4   :  { %s2822_s14 = smov 0   ;;  %s2824_s15 = smov 0  }
   0x5 LB: > { %s2839_s16 = sadd.s32 4294967295, %s2752_s15   ;;  %s2397_s17 = sadd.s32 4294967294, %s2752_s15   ;;  %s2752_s15 = sphi %s2824_s15, %s4331_s15   ;;  %s2748_s14 = sphi %s2822_s14, %s4330_s14   ;;  %s2744_s13 = sphi %s2820_s13, %s4329_s13   ;;  %s2740_s12 = sphi %s2818_s12, %s4328_s12  }
   0x6   : > { %s2843_s18 = sadd.s32 1, %s2752_s15   ;;  %s26_s19 = sadd.s32 1, %s2748_s14 }
   0x7   : > { %s23_s20 = ssub.s32 %s2752_s15, %s2843_s18  ;;  %p33_p0 = scmp.ne.s32.totalorder %s2748_s14, %s2744_s13 }
   0x8   : > { %p24_p1 = scmp.eq.s32.totalorder %s23_s20, 0  ;;  %p34_p2 = scmp.eq.s32.totalorder %s2752_s15, 0 }
   0x9   : > { %p39_p3 = scmp.ne.s32.totalorder %s2744_s13, %s2740_s12  ;;  %p40_p4 = scmp.eq.s32.totalorder %s2839_s16, 0 }
   0xa   : > { %s2855_s21 = scalar_select %p24_p1, %s2748_s14, %s26_s19  }
   0xb   : > { %p2857_p5 = por %p34_p2, %p33_p0  ;;  %p2861_p6 = por %p40_p4, %p39_p3 }
   0xc   : > { %p115_p7 = scmp.eq.s32.totalorder %s2839_s16, 1  ;;  %p121_p8 = scmp.eq.s32.totalorder %s2397_s17, 1 }
   0xd   : > { %p2462_p10 = scmp.lt.s32.totalorder %s2752_s15, 2  ;;  %s141_s26 = sand.u32 1, %s2748_s14  }
   0xe   : > { %p2868_p11 = por %p115_p7, %p33_p0  ;;  %p2872_p12 = por %p121_p8, %p39_p3 }
   0xf   : > { %s2420_s27 = sshll.u32 %s2752_s15, 11  ;;  %s2400_s28 = sshll.u32 %s141_s26, 7 }
  0x10   : > { %s4320_s24 = scalar_select %p2868_p11, 1, 0 }
  0x11   : > { %s4321_s25 = scalar_select %p2872_p12, 1, 0 }
  0x12   : > { %s2881_s4 = scalar_lea.hbm %s4313_s0, %s2420_s27  ;;  %s145_s5 = scalar_lea.vmem [#allocation3], %s2400_s28 }
  0x13   : > { %s152_s6 = sshll.u32 %s145_s5, 4  ;;  %p2885_p13 = pnand %p2462_p10, %p2857_p5  ;;  %s2889_s6 = int_to_ptr.vmem [resolvable:$true] %s152_s6 }
  0x14   : > { %s2891_s8 = scalar_lea.sflag [#allocation4], %s141_s26  ;;  %s2656_s9 = scalar_lea.hbm %s2881_s4, 2048 }
  0x15   : > { %p2657_p0 = scmp.ne.s32.totalorder %s2881_s4, %s2656_s9  ;;  %p2658_p1 = pneg %p2885_p13 }
  0x16   : > { %s2661_s17 = scalar_lea.hbm %s4313_s0, 4096  ;;  %p2662_p4 = scmp.lt.u32.totalorder %s2881_s4, %s4313_s0 }
  0x17   : > { %p2659_p2 = pnand %p2658_p1, %p2657_p0  ;;  %p2663_p5 = scmp.lt.u32.totalorder %s2661_s17, %s2656_s9 }
  0x18   : > { %p2665_p8 = scmp.lt.u32.totalorder %s2656_s9, %s2881_s4 }
  0x19   : > { %p2660_p3 = pneg %p2659_p2  ;;  %p2664_p7 = por %p2663_p5, %p2662_p4 }
  0x1b   : > { %p2666_p10 = por %p2665_p8, %p2664_p7 }
  0x1d   : > { %p2667_p9 = pnand %p2666_p10, %p2660_p3 }
  0x1f   : > { %2670 = shalt.err (!%p2667_p9)
}
  0x20   : > { %s2671_s22 = scalar_lea.vmem %s2889_s6, 2048  ;;  %s2754_s26 = smov [#allocation3]  }
  0x21   : > { %p2672_p0 = scmp.ne.s32.totalorder %s2889_s6, %s2671_s22  ;;  %s2676_s27 = sshll.u32 %s2754_s26, 4  ;;  %s2677_s27 = int_to_ptr.vmem [resolvable:$false] %s2676_s27 }
  0x22   : > { %s2678_s28 = scalar_lea.vmem %s2677_s27, 4096  ;;  %p2679_p11 = scmp.lt.s32.totalorder %s2889_s6, %s2677_s27 }
  0x23   : > { %p2674_p2 = pnand %p2672_p0, %p2658_p1  ;;  %p2680_p4 = scmp.lt.s32.totalorder %s2678_s28, %s2671_s22 }
  0x25   : > { %p2675_p12 = pneg %p2674_p2  ;;  %p2681_p5 = por %p2680_p4, %p2679_p11 }
  0x27   : > { %p2682_p7 = pnand %p2681_p5, %p2675_p12 }
  0x29   : > { %2685 = shalt.err (!%p2682_p7)
}
  0x2a   : > { %s2755_s29 = smov 128   ;;  %s2756_s30 = smov 8  }
  0x2b   : > { %2457 = dma.hbm_to_vmem [thread:$0]  (!%p2885_p13), %s2881_s4, 2048, %s2889_s6, %s2891_s8, %s2755_s29, %s2755_s29, %s2756_s30  }
  0x2c   : > { %p2403_p9 = scmp.ge.s32.totalorder %s2752_s15, 1  ;;  %p174_p1 = scmp.lt.s32.totalorder %s2752_s15, 3 }
  0x2e   : > { %p175_p3 = pnand %p2403_p9, %p174_p1 }
  0x2f   : > { %s2922_s5 = sand.u32 (!%p175_p3), 1, %s2744_s13  }
  0x30   : > { %178 = sbr.rel (%p175_p3) target bundleno = 1053 (0x41d), region = 32  ;;  %s2404_s9 = sshll.u32 (!%p175_p3), %s2922_s5, 7 }
  0x31   : > { %s181_s10 = scalar_lea.sflag (!%p175_p3), [#allocation4], %s2922_s5  ;;  %s2928_s11 = scalar_lea.vmem (!%p175_p3), [#allocation3], %s2404_s9 }
  0x37   : > { %2731 = dma.done.wait (%p2861_p6), %s181_s10, 2048  }
  0x38   : > { %2733 = vsyncadd (%p2861_p6), %s181_s10, 4294965248  ;;  %v2757_v0 = vmov 0.0   ;;  %vm245_vm0 = vcmask 1041409   ;;  %vm248_vm1 = vcmask 1042434   ;;  %vm251_vm2 = vcmask 1043459   ;;  %s2758_s23 = smov 127  }
  0x39   : > { %225 = vst [vmem:[#allocation2 + $0x8] sm:$0xff] %v2757_v0  ;;  %224 = vst [vmem:[#allocation2] sm:$0xff] %v2757_v0  ;;  %2430 = vmatprep.subr.bf16.mxu1 %v2757_v0  ;;  %vm254_vm3 = vcmask 1044484   ;;  %vm257_vm4 = vcmask 1045509   ;;  %vm260_vm5 = vcmask 1046534   ;;  %vm263_vm6 = vcmask 1047559  }
  0x3a   : > { %v445_v1 = vld [vmem:[%s2928_s11 + $0x6] sm:$0x1]  ;;  %v446_v2 = vld [vmem:[%s2928_s11 + $0x16] sm:$0x1]  ;;  %v228_v14 = vld [vmem:[%s2928_s11] sm:$0x1] }
  0x3b   : > { %v447_v3 = vld [vmem:[%s2928_s11 + $0x26] sm:$0x1]  ;;  %v448_v4 = vld [vmem:[%s2928_s11 + $0x36] sm:$0x1]  ;;  %v461_v9 = vrot.slane %v446_v2, 7  ;;  %s2759_s4 = smov 19  }
  0x3c   : > { %v449_v5 = vld [vmem:[%s2928_s11 + $0x46] sm:$0x1]  ;;  %v450_v6 = vld [vmem:[%s2928_s11 + $0x56] sm:$0x1]  ;;  %v463_v10 = vrot.slane %v447_v3, 6  ;;  %v465_v11 = vrot.slane %v448_v4, 5 }
  0x3d   : > { %v451_v7 = vld [vmem:[%s2928_s11 + $0x66] sm:$0x1]  ;;  %v452_v8 = vld [vmem:[%s2928_s11 + $0x76] sm:$0x1]  ;;  %v467_v12 = vrot.slane %v449_v5, 4  ;;  %v469_v13 = vrot.slane %v450_v6, 3  ;;  %v462_v15 = vsel %vm245_vm0, %v461_v9, %v445_v1 }
  0x3e   : > { %v471_v16 = vrot.slane %v451_v7, 2  ;;  %v473_v17 = vrot.slane %v452_v8, 1  ;;  %v229_v18 = vld [vmem:[%s2928_s11 + $0x10] sm:$0x1]  ;;  %v230_v19 = vld [vmem:[%s2928_s11 + $0x20] sm:$0x1]  ;;  %v464_v20 = vsel %vm248_vm1, %v463_v10, %v462_v15 }
  0x3f   : > { %v231_v21 = vld [vmem:[%s2928_s11 + $0x30] sm:$0x1]  ;;  %v232_v22 = vld [vmem:[%s2928_s11 + $0x40] sm:$0x1]  ;;  %v466_v24 = vsel %vm251_vm2, %v465_v11, %v464_v20  ;;  %v244_v27 = vrot.slane %v229_v18, 7  ;;  %v247_v28 = vrot.slane %v230_v19, 6 }
  0x40   : > { %v233_v23 = vld [vmem:[%s2928_s11 + $0x50] sm:$0x1]  ;;  %v234_v25 = vld [vmem:[%s2928_s11 + $0x60] sm:$0x1]  ;;  %v468_v29 = vsel %vm254_vm3, %v467_v12, %v466_v24  ;;  %v250_v30 = vrot.slane %v231_v21, 5  ;;  %v253_v31 = vrot.slane %v232_v22, 4 }
  0x41   : > { %v235_v26 = vld [vmem:[%s2928_s11 + $0x70] sm:$0x1]  ;;  %v256_v32 = vrot.slane %v233_v23, 3  ;;  %v482_v33 = vld [vmem:[%s2928_s11 + $0x7] sm:$0x1]  ;;  %v470_v34 = vsel %vm257_vm4, %v469_v13, %v468_v29  ;;  %v246_v35 = vsel %vm245_vm0, %v244_v27, %v228_v14  ;;  %v259_v36 = vrot.slane %v234_v25, 2 }
  0x42   : > { %v262_v37 = vrot.slane %v235_v26, 1  ;;  %v483_v38 = vld [vmem:[%s2928_s11 + $0x17] sm:$0x1]  ;;  %v484_v39 = vld [vmem:[%s2928_s11 + $0x27] sm:$0x1]  ;;  %v472_v40 = vsel %vm260_vm5, %v471_v16, %v470_v34  ;;  %v249_v41 = vsel %vm248_vm1, %v247_v28, %v246_v35  ;;  %s2760_s6 = smov 17  }
  0x43   : > { %v485_v42 = vld [vmem:[%s2928_s11 + $0x37] sm:$0x1]  ;;  %v486_v43 = vld [vmem:[%s2928_s11 + $0x47] sm:$0x1]  ;;  %v474_v45 = vsel %vm263_vm6, %v473_v17, %v472_v40  ;;  %v252_v46 = vsel %vm251_vm2, %v250_v30, %v249_v41  ;;  %v498_v49 = vrot.slane %v483_v38, 7  ;;  %v500_v50 = vrot.slane %v484_v39, 6 }
  0x44   : > { %v487_v44 = vld [vmem:[%s2928_s11 + $0x57] sm:$0x1]  ;;  %v488_v47 = vld [vmem:[%s2928_s11 + $0x67] sm:$0x1]  ;;  %475 = vrot.lane.b32.xlu0 %v474_v45, %s2758_s23  ;;  %v255_v51 = vsel %vm254_vm3, %v253_v31, %v252_v46  ;;  %v502_v52 = vrot.slane %v485_v42, 5  ;;  %v504_v53 = vrot.slane %v486_v43, 4 }
  0x45   : > { %v489_v48 = vld [vmem:[%s2928_s11 + $0x77] sm:$0x1]  ;;  %v506_v54 = vrot.slane %v487_v44, 3  ;;  %v517_v55 = vld [vmem:[%s2928_s11 + $0x8] sm:$0x1]  ;;  %v258_v56 = vsel %vm257_vm4, %v256_v32, %v255_v51  ;;  %v499_v57 = vsel %vm245_vm0, %v498_v49, %v482_v33  ;;  %v508_v58 = vrot.slane %v488_v47, 2 }
  0x46   : > { %v510_v59 = vrot.slane %v489_v48, 1  ;;  %v518_v60 = vld [vmem:[%s2928_s11 + $0x18] sm:$0x1]  ;;  %v519_v61 = vld [vmem:[%s2928_s11 + $0x28] sm:$0x1]  ;;  %v261_v62 = vsel %vm260_vm5, %v259_v36, %v258_v56  ;;  %v501_v63 = vsel %vm248_vm1, %v500_v50, %v499_v57  ;;  %s2761_s7 = smov 35  }
  0x47   : > { %v520_v1 = vld [vmem:[%s2928_s11 + $0x38] sm:$0x1]  ;;  %v521_v2 = vld [vmem:[%s2928_s11 + $0x48] sm:$0x1]  ;;  %v264_v4 = vsel %vm263_vm6, %v262_v37, %v261_v62  ;;  %v503_v5 = vsel %vm251_vm2, %v502_v52, %v501_v63  ;;  %v533_v8 = vrot.slane %v518_v60, 7  ;;  %v535_v9 = vrot.slane %v519_v61, 6 }
  0x48   : > { %v522_v3 = vld [vmem:[%s2928_s11 + $0x58] sm:$0x1]  ;;  %v523_v6 = vld [vmem:[%s2928_s11 + $0x68] sm:$0x1]  ;;  %265 = vrot.lane.b32.xlu1 %v264_v4, %s2759_s4  ;;  %v505_v10 = vsel %vm254_vm3, %v504_v53, %v503_v5  ;;  %v537_v11 = vrot.slane %v520_v1, 5  ;;  %v539_v12 = vrot.slane %v521_v2, 4 }
  0x49   : > { %v524_v7 = vld [vmem:[%s2928_s11 + $0x78] sm:$0x1]  ;;  %v541_v13 = vrot.slane %v522_v3, 3  ;;  %v270_v14 = vld [vmem:[%s2928_s11 + $0x1] sm:$0x1]  ;;  %v507_v15 = vsel %vm257_vm4, %v506_v54, %v505_v10  ;;  %v534_v16 = vsel %vm245_vm0, %v533_v8, %v517_v55  ;;  %v543_v17 = vrot.slane %v523_v6, 2 }
  0x4a   : > { %v545_v18 = vrot.slane %v524_v7, 1  ;;  %v271_v19 = vld [vmem:[%s2928_s11 + $0x11] sm:$0x1]  ;;  %v272_v20 = vld [vmem:[%s2928_s11 + $0x21] sm:$0x1]  ;;  %v509_v21 = vsel %vm260_vm5, %v508_v58, %v507_v15  ;;  %v536_v22 = vsel %vm248_vm1, %v535_v9, %v534_v16  ;;  %s2762_s8 = smov 37  }
  0x4b   : > { %v273_v23 = vld [vmem:[%s2928_s11 + $0x31] sm:$0x1]  ;;  %v274_v24 = vld [vmem:[%s2928_s11 + $0x41] sm:$0x1]  ;;  %v511_v26 = vsel %vm263_vm6, %v510_v59, %v509_v21  ;;  %v538_v27 = vsel %vm251_vm2, %v537_v11, %v536_v22  ;;  %v286_v30 = vrot.slane %v271_v19, 7  ;;  %v288_v31 = vrot.slane %v272_v20, 6 }
  0x4c   : > { %v275_v25 = vld [vmem:[%s2928_s11 + $0x51] sm:$0x1]  ;;  %v276_v28 = vld [vmem:[%s2928_s11 + $0x61] sm:$0x1]  ;;  %512 = vrot.lane.b32.xlu0 %v511_v26, %s2760_s6  ;;  %v540_v32 = vsel %vm254_vm3, %v539_v12, %v538_v27  ;;  %v290_v33 = vrot.slane %v273_v23, 5  ;;  %v292_v34 = vrot.slane %v274_v24, 4 }
  0x4d   : > { %v277_v29 = vld [vmem:[%s2928_s11 + $0x71] sm:$0x1]  ;;  %v294_v35 = vrot.slane %v275_v25, 3  ;;  %v552_v36 = vld [vmem:[%s2928_s11 + $0x9] sm:$0x1]  ;;  %v542_v37 = vsel %vm257_vm4, %v541_v13, %v540_v32  ;;  %v287_v38 = vsel %vm245_vm0, %v286_v30, %v270_v14  ;;  %v296_v39 = vrot.slane %v276_v28, 2 }
  0x4e   : > { %v298_v40 = vrot.slane %v277_v29, 1  ;;  %v553_v41 = vld [vmem:[%s2928_s11 + $0x19] sm:$0x1]  ;;  %v554_v42 = vld [vmem:[%s2928_s11 + $0x29] sm:$0x1]  ;;  %v544_v43 = vsel %vm260_vm5, %v543_v17, %v542_v37  ;;  %v289_v44 = vsel %vm248_vm1, %v288_v31, %v287_v38  ;;  %s2763_s17 = smov 53  }
  0x4f   : > { %v555_v45 = vld [vmem:[%s2928_s11 + $0x39] sm:$0x1]  ;;  %v556_v46 = vld [vmem:[%s2928_s11 + $0x49] sm:$0x1]  ;;  %v546_v48 = vsel %vm263_vm6, %v545_v18, %v544_v43  ;;  %v291_v49 = vsel %vm251_vm2, %v290_v33, %v289_v44  ;;  %v568_v52 = vrot.slane %v553_v41, 7  ;;  %v570_v53 = vrot.slane %v554_v42, 6 }
  0x50   : > { %v557_v47 = vld [vmem:[%s2928_s11 + $0x59] sm:$0x1]  ;;  %v558_v50 = vld [vmem:[%s2928_s11 + $0x69] sm:$0x1]  ;;  %547 = vrot.lane.b32.xlu1 %v546_v48, %s2761_s7  ;;  %v293_v54 = vsel %vm254_vm3, %v292_v34, %v291_v49  ;;  %v572_v55 = vrot.slane %v555_v45, 5  ;;  %v574_v56 = vrot.slane %v556_v46, 4 }
  0x51   : > { %v559_v51 = vld [vmem:[%s2928_s11 + $0x79] sm:$0x1]  ;;  %v576_v57 = vrot.slane %v557_v47, 3  ;;  %v305_v58 = vld [vmem:[%s2928_s11 + $0x2] sm:$0x1]  ;;  %v295_v59 = vsel %vm257_vm4, %v294_v35, %v293_v54  ;;  %v569_v60 = vsel %vm245_vm0, %v568_v52, %v552_v36  ;;  %v578_v61 = vrot.slane %v558_v50, 2 }
  0x52   : > { %v580_v62 = vrot.slane %v559_v51, 1  ;;  %v306_v63 = vld [vmem:[%s2928_s11 + $0x12] sm:$0x1]  ;;  %v307_v1 = vld [vmem:[%s2928_s11 + $0x22] sm:$0x1]  ;;  %v297_v2 = vsel %vm260_vm5, %v296_v39, %v295_v59  ;;  %v571_v3 = vsel %vm248_vm1, %v570_v53, %v569_v60  ;;  %s2764_s19 = smov 55  }
  0x53   : > { %v308_v4 = vld [vmem:[%s2928_s11 + $0x32] sm:$0x1]  ;;  %v309_v5 = vld [vmem:[%s2928_s11 + $0x42] sm:$0x1]  ;;  %v299_v7 = vsel %vm263_vm6, %v298_v40, %v297_v2  ;;  %v573_v8 = vsel %vm251_vm2, %v572_v55, %v571_v3  ;;  %v321_v11 = vrot.slane %v306_v63, 7  ;;  %v323_v12 = vrot.slane %v307_v1, 6 }
  0x54   : > { %v310_v6 = vld [vmem:[%s2928_s11 + $0x52] sm:$0x1]  ;;  %v311_v9 = vld [vmem:[%s2928_s11 + $0x62] sm:$0x1]  ;;  %300 = vrot.lane.b32.xlu0 %v299_v7, %s2762_s8  ;;  %v575_v13 = vsel %vm254_vm3, %v574_v56, %v573_v8  ;;  %v325_v14 = vrot.slane %v308_v4, 5  ;;  %v327_v15 = vrot.slane %v309_v5, 4 }
  0x55   : > { %v312_v10 = vld [vmem:[%s2928_s11 + $0x72] sm:$0x1]  ;;  %v329_v16 = vrot.slane %v310_v6, 3  ;;  %v587_v17 = vld [vmem:[%s2928_s11 + $0xa] sm:$0x1]  ;;  %v577_v18 = vsel %vm257_vm4, %v576_v57, %v575_v13  ;;  %v322_v19 = vsel %vm245_vm0, %v321_v11, %v305_v58  ;;  %v331_v20 = vrot.slane %v311_v9, 2 }
  0x56   : > { %v333_v21 = vrot.slane %v312_v10, 1  ;;  %v588_v22 = vld [vmem:[%s2928_s11 + $0x1a] sm:$0x1]  ;;  %v589_v23 = vld [vmem:[%s2928_s11 + $0x2a] sm:$0x1]  ;;  %v579_v24 = vsel %vm260_vm5, %v578_v61, %v577_v18  ;;  %v324_v25 = vsel %vm248_vm1, %v323_v12, %v322_v19  ;;  %s2765_s20 = smov 71  }
  0x57   : > { %v590_v26 = vld [vmem:[%s2928_s11 + $0x3a] sm:$0x1]  ;;  %v591_v27 = vld [vmem:[%s2928_s11 + $0x4a] sm:$0x1]  ;;  %v581_v29 = vsel %vm263_vm6, %v580_v62, %v579_v24  ;;  %v326_v30 = vsel %vm251_vm2, %v325_v14, %v324_v25  ;;  %v603_v33 = vrot.slane %v588_v22, 7  ;;  %v605_v34 = vrot.slane %v589_v23, 6 }
  0x58   : > { %v592_v28 = vld [vmem:[%s2928_s11 + $0x5a] sm:$0x1]  ;;  %v593_v31 = vld [vmem:[%s2928_s11 + $0x6a] sm:$0x1]  ;;  %582 = vrot.lane.b32.xlu1 %v581_v29, %s2763_s17  ;;  %v328_v35 = vsel %vm254_vm3, %v327_v15, %v326_v30  ;;  %v607_v36 = vrot.slane %v590_v26, 5  ;;  %v609_v37 = vrot.slane %v591_v27, 4 }
  0x59   : > { %v594_v32 = vld [vmem:[%s2928_s11 + $0x7a] sm:$0x1]  ;;  %v611_v38 = vrot.slane %v592_v28, 3  ;;  %v340_v39 = vld [vmem:[%s2928_s11 + $0x3] sm:$0x1]  ;;  %v330_v40 = vsel %vm257_vm4, %v329_v16, %v328_v35  ;;  %v604_v41 = vsel %vm245_vm0, %v603_v33, %v587_v17  ;;  %v613_v42 = vrot.slane %v593_v31, 2 }
  0x5a   : > { %v615_v43 = vrot.slane %v594_v32, 1  ;;  %v341_v44 = vld [vmem:[%s2928_s11 + $0x13] sm:$0x1]  ;;  %v342_v45 = vld [vmem:[%s2928_s11 + $0x23] sm:$0x1]  ;;  %v332_v46 = vsel %vm260_vm5, %v331_v20, %v330_v40  ;;  %v606_v47 = vsel %vm248_vm1, %v605_v34, %v604_v41  ;;  %s2766_s22 = smov 73  }
  0x5b   : > { %v343_v48 = vld [vmem:[%s2928_s11 + $0x33] sm:$0x1]  ;;  %v344_v49 = vld [vmem:[%s2928_s11 + $0x43] sm:$0x1]  ;;  %v334_v51 = vsel %vm263_vm6, %v333_v21, %v332_v46  ;;  %v608_v52 = vsel %vm251_vm2, %v607_v36, %v606_v47  ;;  %v356_v55 = vrot.slane %v341_v44, 7  ;;  %v358_v56 = vrot.slane %v342_v45, 6 }
  0x5c   : > { %v345_v50 = vld [vmem:[%s2928_s11 + $0x53] sm:$0x1]  ;;  %v346_v53 = vld [vmem:[%s2928_s11 + $0x63] sm:$0x1]  ;;  %335 = vrot.lane.b32.xlu0 %v334_v51, %s2764_s19  ;;  %v610_v57 = vsel %vm254_vm3, %v609_v37, %v608_v52  ;;  %v360_v58 = vrot.slane %v343_v48, 5  ;;  %v362_v59 = vrot.slane %v344_v49, 4 }
  0x5d   : > { %v347_v54 = vld [vmem:[%s2928_s11 + $0x73] sm:$0x1]  ;;  %v364_v60 = vrot.slane %v345_v50, 3  ;;  %v622_v61 = vld [vmem:[%s2928_s11 + $0xb] sm:$0x1]  ;;  %v612_v62 = vsel %vm257_vm4, %v611_v38, %v610_v57  ;;  %v357_v63 = vsel %vm245_vm0, %v356_v55, %v340_v39  ;;  %v366_v1 = vrot.slane %v346_v53, 2 }
  0x5e   : > { %v368_v2 = vrot.slane %v347_v54, 1  ;;  %v623_v3 = vld [vmem:[%s2928_s11 + $0x1b] sm:$0x1]  ;;  %v624_v4 = vld [vmem:[%s2928_s11 + $0x2b] sm:$0x1]  ;;  %v614_v5 = vsel %vm260_vm5, %v613_v42, %v612_v62  ;;  %v359_v6 = vsel %vm248_vm1, %v358_v56, %v357_v63  ;;  %s2767_s26 = smov 89  }
  0x5f   : > { %v625_v7 = vld [vmem:[%s2928_s11 + $0x3b] sm:$0x1]  ;;  %v626_v8 = vld [vmem:[%s2928_s11 + $0x4b] sm:$0x1]  ;;  %v616_v10 = vsel %vm263_vm6, %v615_v43, %v614_v5  ;;  %v361_v11 = vsel %vm251_vm2, %v360_v58, %v359_v6  ;;  %v638_v14 = vrot.slane %v623_v3, 7  ;;  %v640_v15 = vrot.slane %v624_v4, 6 }
  0x60   : > { %v627_v9 = vld [vmem:[%s2928_s11 + $0x5b] sm:$0x1]  ;;  %v628_v12 = vld [vmem:[%s2928_s11 + $0x6b] sm:$0x1]  ;;  %617 = vrot.lane.b32.xlu1 %v616_v10, %s2765_s20  ;;  %v363_v16 = vsel %vm254_vm3, %v362_v59, %v361_v11  ;;  %v642_v17 = vrot.slane %v625_v7, 5  ;;  %v644_v18 = vrot.slane %v626_v8, 4 }
  0x61   : > { %v629_v13 = vld [vmem:[%s2928_s11 + $0x7b] sm:$0x1]  ;;  %v646_v19 = vrot.slane %v627_v9, 3  ;;  %v692_v20 = vld [vmem:[%s2928_s11 + $0xd] sm:$0x1]  ;;  %v365_v21 = vsel %vm257_vm4, %v364_v60, %v363_v16  ;;  %v639_v22 = vsel %vm245_vm0, %v638_v14, %v622_v61  ;;  %v648_v23 = vrot.slane %v628_v12, 2 }
  0x62   : > { %v650_v24 = vrot.slane %v629_v13, 1  ;;  %v693_v25 = vld [vmem:[%s2928_s11 + $0x1d] sm:$0x1]  ;;  %v694_v26 = vld [vmem:[%s2928_s11 + $0x2d] sm:$0x1]  ;;  %v367_v27 = vsel %vm260_vm5, %v366_v1, %v365_v21  ;;  %v641_v28 = vsel %vm248_vm1, %v640_v15, %v639_v22  ;;  %s2768_s27 = smov 125  }
  0x63   : > { %v695_v29 = vld [vmem:[%s2928_s11 + $0x3d] sm:$0x1]  ;;  %v696_v30 = vld [vmem:[%s2928_s11 + $0x4d] sm:$0x1]  ;;  %v369_v32 = vsel %vm263_vm6, %v368_v2, %v367_v27  ;;  %v643_v33 = vsel %vm251_vm2, %v642_v17, %v641_v28  ;;  %v708_v36 = vrot.slane %v693_v25, 7  ;;  %v710_v37 = vrot.slane %v694_v26, 6 }
  0x64   : > { %v697_v31 = vld [vmem:[%s2928_s11 + $0x5d] sm:$0x1]  ;;  %v698_v34 = vld [vmem:[%s2928_s11 + $0x6d] sm:$0x1]  ;;  %370 = vrot.lane.b32.xlu0 %v369_v32, %s2766_s22  ;;  %v645_v38 = vsel %vm254_vm3, %v644_v18, %v643_v33  ;;  %v712_v39 = vrot.slane %v695_v29, 5  ;;  %v714_v40 = vrot.slane %v696_v30, 4 }
  0x65   : > { %v699_v35 = vld [vmem:[%s2928_s11 + $0x7d] sm:$0x1]  ;;  %v716_v41 = vrot.slane %v697_v31, 3  ;;  %v375_v42 = vld [vmem:[%s2928_s11 + $0x4] sm:$0x1]  ;;  %v647_v43 = vsel %vm257_vm4, %v646_v19, %v645_v38  ;;  %v709_v44 = vsel %vm245_vm0, %v708_v36, %v692_v20  ;;  %v718_v45 = vrot.slane %v698_v34, 2 }
  0x66   : > { %v720_v46 = vrot.slane %v699_v35, 1  ;;  %v376_v47 = vld [vmem:[%s2928_s11 + $0x14] sm:$0x1]  ;;  %v377_v48 = vld [vmem:[%s2928_s11 + $0x24] sm:$0x1]  ;;  %v649_v49 = vsel %vm260_vm5, %v648_v23, %v647_v43  ;;  %v711_v50 = vsel %vm248_vm1, %v710_v37, %v709_v44  ;;  %s2769_s28 = smov 91  }
  0x67   : > { %v378_v51 = vld [vmem:[%s2928_s11 + $0x34] sm:$0x1]  ;;  %v379_v52 = vld [vmem:[%s2928_s11 + $0x44] sm:$0x1]  ;;  %v651_v54 = vsel %vm263_vm6, %v650_v24, %v649_v49  ;;  %v713_v55 = vsel %vm251_vm2, %v712_v39, %v711_v50  ;;  %v391_v58 = vrot.slane %v376_v47, 7  ;;  %v393_v59 = vrot.slane %v377_v48, 6 }
  0x68   : > { %v380_v53 = vld [vmem:[%s2928_s11 + $0x54] sm:$0x1]  ;;  %v381_v56 = vld [vmem:[%s2928_s11 + $0x64] sm:$0x1]  ;;  %652 = vrot.lane.b32.xlu1 %v651_v54, %s2767_s26  ;;  %v715_v60 = vsel %vm254_vm3, %v714_v40, %v713_v55  ;;  %v395_v61 = vrot.slane %v378_v51, 5  ;;  %v397_v62 = vrot.slane %v379_v52, 4 }
  0x69   : > { %v382_v57 = vld [vmem:[%s2928_s11 + $0x74] sm:$0x1]  ;;  %v399_v63 = vrot.slane %v380_v53, 3  ;;  %v657_v1 = vld [vmem:[%s2928_s11 + $0xc] sm:$0x1]  ;;  %v717_v2 = vsel %vm257_vm4, %v716_v41, %v715_v60  ;;  %v392_v3 = vsel %vm245_vm0, %v391_v58, %v375_v42  ;;  %v401_v4 = vrot.slane %v381_v56, 2 }
  0x6a   : > { %v403_v5 = vrot.slane %v382_v57, 1  ;;  %v658_v6 = vld [vmem:[%s2928_s11 + $0x1c] sm:$0x1]  ;;  %v659_v7 = vld [vmem:[%s2928_s11 + $0x2c] sm:$0x1]  ;;  %v719_v8 = vsel %vm260_vm5, %v718_v45, %v717_v2  ;;  %v394_v9 = vsel %vm248_vm1, %v393_v59, %v392_v3  ;;  %s2770_s29 = smov 107  }
  0x6b   : > { %v660_v10 = vld [vmem:[%s2928_s11 + $0x3c] sm:$0x1]  ;;  %v661_v11 = vld [vmem:[%s2928_s11 + $0x4c] sm:$0x1]  ;;  %v721_v13 = vsel %vm263_vm6, %v720_v46, %v719_v8  ;;  %v396_v14 = vsel %vm251_vm2, %v395_v61, %v394_v9  ;;  %v673_v17 = vrot.slane %v658_v6, 7  ;;  %v675_v18 = vrot.slane %v659_v7, 6 }
  0x6c   : > { %v662_v12 = vld [vmem:[%s2928_s11 + $0x5c] sm:$0x1]  ;;  %v663_v15 = vld [vmem:[%s2928_s11 + $0x6c] sm:$0x1]  ;;  %722 = vrot.lane.b32.xlu0 %v721_v13, %s2768_s27  ;;  %v398_v19 = vsel %vm254_vm3, %v397_v62, %v396_v14  ;;  %v677_v20 = vrot.slane %v660_v10, 5  ;;  %v679_v21 = vrot.slane %v661_v11, 4 }
  0x6d   : > { %v664_v16 = vld [vmem:[%s2928_s11 + $0x7c] sm:$0x1]  ;;  %v681_v22 = vrot.slane %v662_v12, 3  ;;  %v729_v23 = vld [vmem:[%s2928_s11 + $0xe] sm:$0x1]  ;;  %v400_v24 = vsel %vm257_vm4, %v399_v63, %v398_v19  ;;  %v674_v25 = vsel %vm245_vm0, %v673_v17, %v657_v1  ;;  %v683_v26 = vrot.slane %v663_v15, 2 }
  0x6e   : > { %v685_v27 = vrot.slane %v664_v16, 1  ;;  %v730_v28 = vld [vmem:[%s2928_s11 + $0x1e] sm:$0x1]  ;;  %v731_v29 = vld [vmem:[%s2928_s11 + $0x2e] sm:$0x1]  ;;  %v402_v30 = vsel %vm260_vm5, %v401_v4, %v400_v24  ;;  %v676_v31 = vsel %vm248_vm1, %v675_v18, %v674_v25  ;;  %s2771_s30 = smov 15  }
  0x6f   : > { %v732_v32 = vld [vmem:[%s2928_s11 + $0x3e] sm:$0x1]  ;;  %v733_v33 = vld [vmem:[%s2928_s11 + $0x4e] sm:$0x1]  ;;  %v404_v35 = vsel %vm263_vm6, %v403_v5, %v402_v30  ;;  %v678_v36 = vsel %vm251_vm2, %v677_v20, %v676_v31  ;;  %v745_v39 = vrot.slane %v730_v28, 7  ;;  %v747_v40 = vrot.slane %v731_v29, 6 }
  0x70   : > { %v734_v34 = vld [vmem:[%s2928_s11 + $0x5e] sm:$0x1]  ;;  %v735_v37 = vld [vmem:[%s2928_s11 + $0x6e] sm:$0x1]  ;;  %405 = vrot.lane.b32.xlu1 %v404_v35, %s2769_s28  ;;  %v680_v41 = vsel %vm254_vm3, %v679_v21, %v678_v36  ;;  %v749_v42 = vrot.slane %v732_v32, 5  ;;  %v751_v43 = vrot.slane %v733_v33, 4 }
  0x71   : > { %v736_v38 = vld [vmem:[%s2928_s11 + $0x7e] sm:$0x1]  ;;  %v753_v44 = vrot.slane %v734_v34, 3  ;;  %v410_v45 = vld [vmem:[%s2928_s11 + $0x5] sm:$0x1]  ;;  %v682_v46 = vsel %vm257_vm4, %v681_v22, %v680_v41  ;;  %v746_v47 = vsel %vm245_vm0, %v745_v39, %v729_v23  ;;  %v755_v48 = vrot.slane %v735_v37, 2 }
  0x72   : > { %v757_v49 = vrot.slane %v736_v38, 1  ;;  %v411_v50 = vld [vmem:[%s2928_s11 + $0x15] sm:$0x1]  ;;  %v412_v51 = vld [vmem:[%s2928_s11 + $0x25] sm:$0x1]  ;;  %v684_v52 = vsel %vm260_vm5, %v683_v26, %v682_v46  ;;  %v748_v53 = vsel %vm248_vm1, %v747_v40, %v746_v47  ;;  %s2772_s10 = smov 109  }
  0x73   : > { %v413_v54 = vld [vmem:[%s2928_s11 + $0x35] sm:$0x1]  ;;  %v414_v55 = vld [vmem:[%s2928_s11 + $0x45] sm:$0x1]  ;;  %v686_v57 = vsel %vm263_vm6, %v685_v27, %v684_v52  ;;  %v750_v58 = vsel %vm251_vm2, %v749_v42, %v748_v53  ;;  %v426_v61 = vrot.slane %v411_v50, 7  ;;  %v428_v62 = vrot.slane %v412_v51, 6 }
  0x74   : > { %v415_v56 = vld [vmem:[%s2928_s11 + $0x55] sm:$0x1]  ;;  %v416_v59 = vld [vmem:[%s2928_s11 + $0x65] sm:$0x1]  ;;  %687 = vrot.lane.b32.xlu0 %v686_v57, %s2770_s29  ;;  %v752_v63 = vsel %vm254_vm3, %v751_v43, %v750_v58  ;;  %v430_v1 = vrot.slane %v413_v54, 5  ;;  %v432_v2 = vrot.slane %v414_v55, 4 }
  0x75   : > { %v417_v60 = vld [vmem:[%s2928_s11 + $0x75] sm:$0x1]  ;;  %v434_v3 = vrot.slane %v415_v56, 3  ;;  %v764_v4 = vld [vmem:[%s2928_s11 + $0xf] sm:$0x1]  ;;  %v754_v5 = vsel %vm257_vm4, %v753_v44, %v752_v63  ;;  %v427_v6 = vsel %vm245_vm0, %v426_v61, %v410_v45  ;;  %v436_v7 = vrot.slane %v416_v59, 2 }
  0x76   : > { %v438_v8 = vrot.slane %v417_v60, 1  ;;  %v765_v9 = vld [vmem:[%s2928_s11 + $0x1f] sm:$0x1]  ;;  %v766_v10 = vld [vmem:[%s2928_s11 + $0x2f] sm:$0x1]  ;;  %v756_v11 = vsel %vm260_vm5, %v755_v48, %v754_v5  ;;  %v429_v12 = vsel %vm248_vm1, %v428_v62, %v427_v6  ;;  %vm226_vm7 = vcmask 572416  }
  0x77   : > { %v767_v13 = vld [vmem:[%s2928_s11 + $0x3f] sm:$0x1]  ;;  %v768_v14 = vld [vmem:[%s2928_s11 + $0x4f] sm:$0x1]  ;;  %v758_v16 = vsel %vm263_vm6, %v757_v49, %v756_v11  ;;  %v431_v17 = vsel %vm251_vm2, %v430_v1, %v429_v12  ;;  %v780_v19 = vrot.slane %v765_v9, 7  ;;  %v782_v20 = vrot.slane %v766_v10, 6 }
  0x78   : > { %v769_v15 = vld [vmem:[%s2928_s11 + $0x5f] sm:$0x1]  ;;  %v770_v18 = vld [vmem:[%s2928_s11 + $0x6f] sm:$0x1]  ;;  %759 = vrot.lane.b32.xlu1 %v758_v16, %s2771_s30  ;;  %v433_v21 = vsel %vm254_vm3, %v432_v2, %v431_v17  ;;  %v784_v23 = vrot.slane %v767_v13, 5  ;;  %v786_v24 = vrot.slane %v768_v14, 4 }
  0x79   : > { %v771_v22 = vld [vmem:[%s2928_s11 + $0x7f] sm:$0x1]  ;;  %v435_v25 = vsel %vm257_vm4, %v434_v3, %v433_v21  ;;  %v781_v26 = vsel %vm245_vm0, %v780_v19, %v764_v4  ;;  %v788_v27 = vrot.slane %v769_v15, 3  ;;  %v790_v30 = vrot.slane %v770_v18, 2  ;;  %227 = vst.msk [vmem:[#allocation2 + $0x10] sm:$0xff] %vm226_vm7, %v2757_v0  ;;  %s2773_s11 = smov 33  }
  0x7a   : > { %v437_v28 = vsel %vm260_vm5, %v436_v7, %v435_v25  ;;  %v783_v29 = vsel %vm248_vm1, %v782_v20, %v781_v26  ;;  %v792_v33 = vrot.slane %v771_v22, 1  ;;  %vm480_vm8 = vcmask 121856   ;;  %s2774_s4 = smov 90   ;;  %s2775_s6 = smov 126  }
  0x7b   : > { %v439_v31 = vsel %vm263_vm6, %v438_v8, %v437_v28  ;;  %v785_v32 = vsel %vm251_vm2, %v784_v23, %v783_v29  ;;  %vm268_vm9 = vcmask 285848   ;;  %vm515_vm10 = vcmask 269448   ;;  %s2776_s7 = smov 92   ;;  %s2777_s8 = smov 110  }
  0x7c   : > { %440 = vrot.lane.b32.xlu0 %v439_v31, %s2772_s10  ;;  %v787_v34 = vsel %vm254_vm3, %v786_v24, %v785_v32  ;;  %vm550_vm11 = vcmask 417048   ;;  %vm303_vm12 = vcmask 433448   ;;  %vm585_vm13 = vcmask 564648   ;;  %s2778_s17 = smov 108   ;;  %p215_p6 = scmp.lt.s32.totalorder %s2839_s16, 1 }
  0x7d   : > { %v789_v35 = vsel %vm257_vm4, %v788_v27, %v787_v34  ;;  %vm338_vm14 = vcmask 581048   ;;  %vm620_vm15 = vcmask 712248   ;;  %vm373_vm0 = vcmask 728648   ;;  %s2789_s20 = smov 76   ;;  %s2790_s22 = smov 2  }
  0x7e   : > { %v791_v36 = vsel %vm260_vm5, %v790_v30, %v789_v35  ;;  %vm655_vm1 = vcmask 859848   ;;  %vm727_vm2 = vcmask 105472   ;;  %vm408_vm3 = vcmask 876248   ;;  %s216_s19 = scalar_select %p215_p6, %s2839_s16, 1 }
  0x7f   : > { %v793_v37 = vsel %vm263_vm6, %v792_v33, %v791_v36  ;;  %vm690_vm4 = vcmask 1007448   ;;  %vm725_vm5 = vcmask 1048552   ;;  %vm762_vm6 = vcmask 253048   ;;  %s2793_s29 = smov 22   ;;  %s2794_s30 = smov 4  }
  0x80   : > { %794 = vrot.lane.b32.xlu1 %v793_v37, %s2773_s11  ;;  %vm443_vm7 = vcmask 1023848   ;;  %v2780_v10 = vmov 0   ;;  %s2407_s27 = sshll.u32 %s216_s19, 3  ;;  %s2782_s11 = smov 114  }
  0x81   : > { %979 = vmatprep.mubr.bf16.mxu0 %v2780_v10  ;;  %2653 = vset.pattern.permute.xlu1 %v2780_v10  ;;  %p4325_p12 = scmp.ne.s32.totalorder %s4320_s24, 0 }
  0x82   : > { %2654 = vset.pattern.permute.xlu0 %v2780_v10 }
  0xb6   : > { %v476_v38 = vpop.permute.xlu0 %475 }
  0xb7   : > { %481 = vst.msk [vmem:[#allocation2 + $0x8] sm:$0xff] %vm480_vm8, %v476_v38  ;;  %vm478_vm8 = vcmask 1048568  }
  0xba   : > { %v266_v39 = vpop.permute.xlu1 %265 }
  0xbb   : > { %269 = vst.msk [vmem:[#allocation2] sm:$0xff] %vm268_vm9, %v266_v39  ;;  %vm797_vm9 = vcmask 400648  }
  0xbe   : > { %v513_v40 = vpop.permute.xlu0 %512 }
  0xbf   : > { %516 = vst.msk [vmem:[#allocation2 + $0x8] sm:$0xff] %vm515_vm10, %v513_v40  ;;  %vm2779_vm10 = vmmov 0  }
  0xc0   : > { %2436 = vmatprep.mubr.msk.bf16.mxu1 %vm2779_vm10, %v2757_v0 }
  0xc2   : > { %v548_v41 = vpop.permute.xlu1 %547 }
  0xc3   : > { %551 = vst.msk [vmem:[#allocation2 + $0x8] sm:$0xff] %vm550_vm11, %v548_v41  ;;  %vm904_vm11 = vcmask 1043456  }
  0xc6   : > { %v301_v42 = vpop.permute.xlu0 %300 }
  0xc7   : > { %304 = vst.msk [vmem:[#allocation2] sm:$0xff] %vm303_vm12, %v301_v42  ;;  %vm826_vm12 = vcmask 1031168  }
  0xca   : > { %v583_v43 = vpop.permute.xlu1 %582 }
  0xcb   : > { %586 = vst.msk [vmem:[#allocation2 + $0x8] sm:$0xff] %vm585_vm13, %v583_v43  ;;  %vm814_vm13 = vcmask 1039360  }
  0xce   : > { %v336_v44 = vpop.permute.xlu0 %335 }
  0xcf   : > { %339 = vst.msk [vmem:[#allocation2] sm:$0xff] %vm338_vm14, %v336_v44  ;;  %vm838_vm14 = vcmask 900096  }
  0xd2   : > { %v618_v45 = vpop.permute.xlu1 %617 }
  0xd3   : > { %621 = vst.msk [vmem:[#allocation2 + $0x8] sm:$0xff] %vm620_vm15, %v618_v45  ;;  %vm850_vm15 = vcmask 891904  }
  0xd6   : > { %v371_v46 = vpop.permute.xlu0 %370 }
  0xd7   : > { %374 = vst.msk [vmem:[#allocation2] sm:$0xff] %vm373_vm0, %v371_v46  ;;  %vm874_vm0 = vcmask 752640  }
  0xda   : > { %v653_v47 = vpop.permute.xlu1 %652 }
  0xdb   : > { %656 = vst.msk [vmem:[#allocation2 + $0x8] sm:$0xff] %vm655_vm1, %v653_v47  ;;  %vm862_vm1 = vcmask 883712  }
  0xde   : > { %v723_v48 = vpop.permute.xlu0 %722 }
  0xdf   : > { %728 = vst.msk [vmem:[#allocation2 + $0x10] sm:$0xff] %vm727_vm2, %v723_v48  ;;  %vm886_vm2 = vcmask 744448  }
  0xe2   : > { %v406_v49 = vpop.permute.xlu1 %405 }
  0xe3   : > { %409 = vst.msk [vmem:[#allocation2] sm:$0xff] %vm408_vm3, %v406_v49  ;;  %vm937_vm3 = vcmask 1041408  }
  0xe6   : > { %v688_v50 = vpop.permute.xlu0 %687 }
  0xe7   : > { %691 = vst.msk [vmem:[#allocation2 + $0x8] sm:$0xff] %vm690_vm4, %v688_v50  ;;  %vm898_vm4 = vcmask 736256  }
  0xe8   : > { %726 = vst.msk [vmem:[#allocation2 + $0x8] sm:$0xff] %vm725_vm5, %v723_v48  ;;  %vm933_vm5 = vcmask 293888  }
  0xea   : > { %v760_v51 = vpop.permute.xlu1 %759 }
  0xeb   : > { %763 = vst.msk [vmem:[#allocation2 + $0x10] sm:$0xff] %vm762_vm6, %v760_v51  ;;  %vm1323_vm6 = vcmask 122880  }
  0xee   : > { %v441_v52 = vpop.permute.xlu0 %440 }
  0xef   : > { %444 = vst.msk [vmem:[#allocation2] sm:$0xff] %vm443_vm7, %v441_v52  ;;  %v3187_v59 = vld [vmem:[#allocation2 + $0x8] sm:$0xf]  ;;  %v1029_v62 = vld [vmem:[#allocation2 + $0x8] sm:$0xf0]  ;;  %vm1703_vm7 = vcmask 15360  }
  0xf0   : > { %479 = vst.msk [vmem:[#allocation2] sm:$0xff] %vm478_vm8, %v476_v38  ;;  %v806_v3 = vrot.slane %v3187_v59, 4  ;;  %v3207_v5 = vrot.slane %v1029_v62, 4  ;;  %vm2148_vm8 = vcmask 31744  }
  0xf2   : > { %v795_v53 = vpop.permute.xlu1 %794 }
  0xf3   : > { %798 = vst.msk [vmem:[#allocation2 + $0x10] sm:$0xff] %vm797_vm9, %v795_v53 }
  0xf7   : > { %v1028_v54 = vld [vmem:[#allocation2] sm:$0xf0]  ;;  %v3183_v57 = vld [vmem:[#allocation2] sm:$0xf] }
  0xf8   : > { %v805_v61 = vrot.slane %v3183_v57, 4  ;;  %v2558_v1 = vpack.i.bf16 %v3187_v59, %v3183_v57  ;;  %v2593_v6 = vpack.i.bf16 %v3207_v5, %v3183_v57  ;;  %v3214_v7 = vrot.slane %v1028_v54, 4 }
  0xfa   : > { %v3181_v55 = vld [vmem:[#allocation2 + $0x10] sm:$0xf]  ;;  %v1030_v56 = vld [vmem:[#allocation2 + $0x10] sm:$0xf0]  ;;  %v2563_v63 = vpack.i.bf16 %v1029_v62, %v805_v61  ;;  %v2648_v11 = vpack.i.bf16 %v3207_v5, %v3214_v7 }
  0xfb   : > { %896 = vrot.lane.b32.xlu1 %v3181_v55, %s2774_s4  ;;  %v2538_v58 = vpack.i.bf16 %v1028_v54, %v1030_v56  ;;  %v2543_v60 = vpack.i.bf16 %v3181_v55, %v3187_v59  ;;  %v807_v2 = vrot.slane %v3181_v55, 4  ;;  %v3216_v8 = vrot.slane %v1030_v56, 4 }
  0xfd   : > { %2539 = vrot.lane.b32.xlu0 %v2538_v58, %s2758_s23  ;;  %v2583_v4 = vpack.i.bf16 %v807_v2, %v806_v3  ;;  %v2608_v9 = vpack.i.bf16 %v3214_v7, %v3216_v8 }
  0xff   : > { %2544 = vrot.lane.b32.xlu1 %v2543_v60, %s2775_s6 }
 0x101   : > { %2549 = vrot.lane.b32.xlu0 %v2543_v60, %s2772_s10 }
 0x103   : > { %2564 = vrot.lane.b32.xlu1 %v2563_v63, %s2758_s23 }
 0x105   : > { %2554 = vrot.lane.b32.xlu0 %v2543_v60, %s2776_s7 }
 0x107   : > { %2569 = vrot.lane.b32.xlu1 %v2563_v63, %s2777_s8 }
 0x109   : > { %2559 = vrot.lane.b32.xlu0 %v2558_v1, %s2774_s4 }
 0x10b   : > { %2574 = vrot.lane.b32.xlu1 %v2563_v63, %s2778_s17 }
 0x10d   : > { %2584 = vrot.lane.b32.xlu0 %v2583_v4, %s2758_s23  ;;  %s2406_s23 = sshll.u32 %s216_s19, 2  ;;  %s2787_s19 = smov 112  }
 0x10e   : > { %s3226_s26 = scalar_lea.vmem %s4314_s1, %s2406_s23  ;;  %s2788_s23 = smov 94  }
 0x10f   : > { %2579 = vrot.lane.b32.xlu1 %v2563_v63, %s2769_s28 }
 0x111   : > { %2589 = vrot.lane.b32.xlu0 %v2583_v4, %s2777_s8 }
 0x113   : > { %2599 = vrot.lane.b32.xlu1 %v2583_v4, %s2778_s17 }
 0x115   : > { %2594 = vrot.lane.b32.xlu0 %v2593_v6, %s2775_s6 }
 0x117   : > { %2604 = vrot.lane.b32.xlu1 %v2583_v4, %s2769_s28 }
 0x119   : > { %2614 = vrot.lane.b32.xlu0 %v2593_v6, %s2772_s10 }
 0x11b   : > { %2609 = vrot.lane.b32.xlu1 %v2608_v9, %s2775_s6  ;;  %s2785_s6 = smov 38  }
 0x11d   : > { %2619 = vrot.lane.b32.xlu0 %v2593_v6, %s2776_s7 }
 0x11f   : > { %2629 = vrot.lane.b32.xlu1 %v2608_v9, %s2772_s10  ;;  %s222_s10 = scalar_lea.vmem %s4315_s2, %s2407_s27  ;;  %s2792_s27 = smov 40  }
 0x120   : > { %v927_v12 = vld [vmem:[%s222_s10] sm:$0xf]  ;;  %v1150_v13 = vld [vmem:[%s222_s10 + $0x4] sm:$0xf] }
 0x121   : > { %2624 = vrot.lane.b32.xlu0 %v2538_v58, %s2777_s8 }
 0x123   : > { %2639 = vrot.lane.b32.xlu1 %v2608_v9, %s2776_s7 }
 0x125   : > { %2634 = vrot.lane.b32.xlu0 %v2538_v58, %s2778_s17  ;;  %s2786_s17 = smov 20  }
 0x127   : > { %2649 = vrot.lane.b32.xlu1 %v2648_v11, %s2774_s4 }
 0x129   : > { %2644 = vrot.lane.b32.xlu0 %v2538_v58, %s2769_s28  ;;  %s3435_s28 = scalar_lea.vmem [#allocation6], %s2404_s9  ;;  %s2783_s9 = smov 74  }
 0x12b   : > { %930 = vperm.xlu1 %2653, %v927_v12  }
 0x12d   : > { %1121 = vrot.lane.b32.xlu0 %v3216_v8, %s2774_s4  ;;  %s2784_s4 = smov 56  }
 0x131   : > { %1153 = vperm.xlu0 %2654, %v1150_v13  }
 0x16d   : > { %v3248_v14 = vpop.permute.xlu1 %896 }
 0x16e   : > { %v925_v29 = vpack.c.bf16 %v3248_v14, %v3248_v14 }
 0x16f   : > { %v3250_v15 = vpop.permute.xlu0 %2539 }
 0x170   : > { %v2542_v54 = vunpack.i.h.bf16 %v3250_v15 }
 0x171   : > { %v2545_v16 = vpop.permute.xlu1 %2544 }
 0x172   : > { %v2547_v26 = vunpack.i.h.bf16 %v2545_v16  ;;  %v2546_v27 = vunpack.i.l.bf16 %v2545_v16 }
 0x173   : > { %v3252_v17 = vpop.permute.xlu0 %2549 }
 0x174   : > { %v2552_v32 = vunpack.i.h.bf16 %v3252_v17  ;;  %v2551_v33 = vunpack.i.l.bf16 %v3252_v17  ;;  %v828_v40 = vsel %vm826_vm12, %v2546_v27, %v2547_v26 }
 0x175   : > { %v3254_v18 = vpop.permute.xlu1 %2564 }
 0x176   : > { %v2566_v36 = vunpack.i.l.bf16 %v3254_v18  ;;  %v2567_v56 = vunpack.i.h.bf16 %v3254_v18 }
 0x177   : > { %v3256_v19 = vpop.permute.xlu0 %2554 }
 0x178   : > { %v2557_v37 = vunpack.i.h.bf16 %v3256_v19  ;;  %v2556_v38 = vunpack.i.l.bf16 %v3256_v19 }
 0x179   : > { %v3258_v20 = vpop.permute.xlu1 %2569 }
 0x17a   : > { %v2571_v50 = vunpack.i.l.bf16 %v3258_v20  ;;  %v876_v6 = vsel %vm874_vm0, %v2556_v38, %v2557_v37 }
 0x17b   : > { %v3260_v21 = vpop.permute.xlu0 %2559 }
 0x17c   : > { %v2561_v16 = vunpack.i.l.bf16 %v3260_v21 }
 0x17d   : > { %v3262_v22 = vpop.permute.xlu1 %2574 }
 0x17e   : > { %v2577_v19 = vunpack.i.h.bf16 %v3262_v22 }
 0x17f   : > { %v2585_v23 = vpop.permute.xlu0 %2584 }
 0x180   : > { %v2587_v24 = vunpack.i.h.bf16 %v2585_v23  ;;  %v2586_v25 = vunpack.i.l.bf16 %v2585_v23 }
 0x181   : > { %v3264_v28 = vpop.permute.xlu1 %2579 }
 0x182   : > { %v816_v31 = vsel %vm814_vm13, %v2586_v25, %v2587_v24  ;;  %v907_v41 = vsel %vm904_vm11, %v3181_v55, %v2587_v24  ;;  %v815_v53 = vsel %vm814_vm13, %v2566_v36, %v2586_v25  ;;  %v2541_v55 = vunpack.i.l.bf16 %v3250_v15 }
 0x183   : > { %v2590_v30 = vpop.permute.xlu0 %2589  ;;  %v906_v44 = vsel %vm904_vm11, %v3187_v59, %v816_v31  ;;  %v852_v59 = vsel %vm850_vm15, %v2551_v33, %v2552_v32  ;;  %v905_v2 = vsel %vm904_vm11, %v3183_v57, %v815_v53  ;;  %v2562_v15 = vunpack.i.h.bf16 %v3260_v21 }
 0x184   : > { %v2592_v34 = vunpack.i.h.bf16 %v2590_v30  ;;  %v2591_v35 = vunpack.i.l.bf16 %v2590_v30  ;;  %v1130_v30 = vsel %vm904_vm11, %v3216_v8, %v2541_v55 }
 0x185   : > { %v3274_v39 = vpop.permute.xlu1 %2599 }
 0x186   : > { %v910_v42 = vsel %vm904_vm11, %v2547_v26, %v2592_v34  ;;  %v840_v43 = vsel %vm838_vm14, %v2591_v35, %v2592_v34  ;;  %v2602_v45 = vunpack.i.h.bf16 %v3274_v39  ;;  %v2601_v46 = vunpack.i.l.bf16 %v3274_v39 }
 0x187   : > { %v3285_v47 = vpop.permute.xlu0 %2594  ;;  %v919_v48 = vpack.c.bf16 %v910_v42, %v907_v41  ;;  %v909_v49 = vsel %vm904_vm11, %v828_v40, %v840_v43  ;;  %v839_v63 = vsel %vm838_vm14, %v2571_v50, %v2591_v35  ;;  %v1047_v26 = vsel %vm814_vm13, %v2567_v56, %v2541_v55 }
 0x188   : > { %v2596_v51 = vunpack.i.l.bf16 %v3285_v47  ;;  %v918_v52 = vpack.c.bf16 %v909_v49, %v906_v44  ;;  %v864_v4 = vsel %vm862_vm1, %v2601_v46, %v2602_v45  ;;  %v913_v12 = vsel %vm904_vm11, %v2552_v32, %v2602_v45 }
 0x189   : > { %v2605_v58 = vpop.permute.xlu1 %2604  ;;  %2431 = vmatpush3.bf16.msra.mxu1 %v919_v48  ;;  %v912_v24 = vsel %vm904_vm11, %v852_v59, %v864_v4  ;;  %v945_v32 = vsel %vm937_vm3, %v925_v29, 0  ;;  %v2576_v34 = vunpack.i.l.bf16 %v3262_v22  ;;  %v2581_v35 = vunpack.i.l.bf16 %v3264_v28 }
 0x18a   : > { %v2607_v60 = vunpack.i.h.bf16 %v2605_v58  ;;  %v2606_v61 = vunpack.i.l.bf16 %v2605_v58  ;;  %947 = vmatprep.subr.bf16.mxu0 %v918_v52  ;;  %2432 = vmatprep.subr.bf16.mxu1 %v2757_v0  ;;  %v827_v62 = vsel %vm826_vm12, %v2596_v51, %v2546_v27  ;;  %v1046_v27 = vsel %vm814_vm13, %v2542_v54, %v2567_v56 }
 0x18b   : > { %v3300_v1 = vpop.permute.xlu0 %2614  ;;  %v908_v3 = vsel %vm904_vm11, %v827_v62, %v839_v63  ;;  %v900_v29 = vsel %vm898_vm4, %v2562_v15, %v3248_v14  ;;  %v899_v39 = vsel %vm898_vm4, %v2561_v16, %v2562_v15  ;;  %v1129_v40 = vsel %vm904_vm11, %v3207_v5, %v1047_v26 }
 0x18c   : > { %v2616_v9 = vunpack.i.l.bf16 %v3300_v1  ;;  %v917_v11 = vpack.c.bf16 %v908_v3, %v905_v2  ;;  %v916_v13 = vsel %vm904_vm11, %v2557_v37, %v2607_v60  ;;  %v888_v23 = vsel %vm886_vm2, %v2606_v61, %v2607_v60 }
 0x18d   : > { %v2610_v57 = vpop.permute.xlu1 %2609  ;;  %v922_v18 = vpack.c.bf16 %v916_v13, %v913_v12  ;;  %v915_v25 = vsel %vm904_vm11, %v876_v6, %v888_v23  ;;  %v3343_v41 = vsel %vm904_vm11, %v3214_v7, %v1046_v27  ;;  %v863_v17 = vsel %vm862_vm1, %v2576_v34, %v2601_v46  ;;  %v926_v7 = vld [vmem:[%s3226_s26] sm:$0x3] }
 0x18e   : > { %948 = vmatpush1.bf16.msra.mxu0 %v917_v11  ;;  %v921_v21 = vpack.c.bf16 %v915_v25, %v912_v24  ;;  %v851_v8 = vsel %vm850_vm15, %v2616_v9, %v2551_v33  ;;  %v2612_v42 = vunpack.i.h.bf16 %v2610_v57  ;;  %v887_v43 = vsel %vm886_vm2, %v2581_v35, %v2606_v61 }
 0x18f   : > { %2433 = vmatpush3.bf16.msra.mxu1 %v922_v18  ;;  %v3321_v31 = vpop.permute.xlu0 %2619  ;;  %v2572_v14 = vunpack.i.h.bf16 %v3258_v20  ;;  %v2611_v44 = vunpack.i.l.bf16 %v2610_v57  ;;  %v911_v5 = vsel %vm904_vm11, %v851_v8, %v863_v17  ;;  %v2597_v49 = vunpack.i.h.bf16 %v3285_v47 }
 0x190   : > { %v2621_v36 = vunpack.i.l.bf16 %v3321_v31  ;;  %2434 = vmatprep.subr.bf16.mxu1 %v2757_v0  ;;  %949 = vmatprep.subr.bf16.mxu0 %v921_v21  ;;  %v924_v52 = vpack.c.bf16 %v900_v29, %v900_v29  ;;  %v923_v53 = vpack.c.bf16 %v899_v39, %v899_v39  ;;  %v2582_v12 = vunpack.i.h.bf16 %v3264_v28 }
 0x191   : > { %v3334_v37 = vpop.permute.xlu1 %2629  ;;  %v1057_v54 = vsel %vm826_vm12, %v2612_v42, %v2597_v49  ;;  %v1058_v60 = vsel %vm826_vm12, %v2597_v49, %v2611_v44  ;;  %v2622_v13 = vunpack.i.h.bf16 %v3321_v31  ;;  %v2655_v42 = vld [vmem:[%s3226_s26] ss:$0 sps:$4 sm:$0xcc]   ;;  %s2791_s26 = smov 58  }
 0x192   : > { %v875_v33 = vsel %vm874_vm0, %v2621_v36, %v2556_v38  ;;  %v2617_v38 = vunpack.i.h.bf16 %v3300_v1  ;;  %v2632_v55 = vunpack.i.h.bf16 %v3334_v37  ;;  %v2631_v58 = vunpack.i.l.bf16 %v3334_v37 }
 0x193   : > { %2435 = vmatpush3.bf16.msra.mxu1 %v945_v32  ;;  %v2625_v45 = vpop.permute.xlu0 %2624  ;;  %v914_v48 = vsel %vm904_vm11, %v875_v33, %v887_v43  ;;  %v939_v6 = vsel %vm937_vm3, %v923_v53, 0  ;;  %v1270_v53 = vlaneseq }
 0x194   : > { %v2627_v50 = vunpack.i.h.bf16 %v2625_v45  ;;  %v2626_v46 = vunpack.i.l.bf16 %v2625_v45  ;;  %v920_v51 = vpack.c.bf16 %v914_v48, %v911_v5  ;;  %2440 = vmatprep.subr.bf16.mxu1 %v2757_v0  ;;  %v1079_v15 = vsel %vm850_vm15, %v2632_v55, %v2617_v38 }
 0x195   : > { %v2640_v20 = vpop.permute.xlu1 %2639  ;;  %v1080_v24 = vsel %vm850_vm15, %v2617_v38, %v2631_v58  ;;  %v1159_v45 = vrot.slane %v2655_v42, 2 }
 0x196   : > { %v1068_v56 = vsel %vm838_vm14, %v2627_v50, %v2572_v14  ;;  %v1133_v47 = vsel %vm904_vm11, %v2611_v44, %v2626_v46  ;;  %950 = vmatpush1.bf16.msra.mxu0 %v920_v51  ;;  %2437 = vmatmul.mubr.msk.bf16.vlgmr.msra.gmra.mrb[0].mxu1 %vm933_vm5, %v926_v7  ;;  %v1069_v61 = vsel %vm838_vm14, %v2572_v14, %v2626_v46  ;;  %v2642_v62 = vunpack.i.h.bf16 %v2640_v20 }
 0x197   : > { %v2635_v59 = vpop.permute.xlu0 %2634  ;;  %2408 = vmatprep.subr.msk.bf16.mxu0 %vm937_vm3, %v924_v52  ;;  %v1142_v22 = vpack.c.bf16 %v1133_v47, %v1130_v30  ;;  %2446 = vmatprep.mubr.msk.bf16.mxu1 %vm2779_vm10, %v2757_v0  ;;  %v1132_v2 = vsel %vm904_vm11, %v1058_v60, %v1069_v61  ;;  %v2641_v3 = vunpack.i.l.bf16 %v2640_v20  ;;  %v1131_v11 = vsel %vm904_vm11, %v1057_v54, %v1068_v56 }
 0x198   : > { %v2637_v63 = vunpack.i.h.bf16 %v2635_v59  ;;  %v2636_v1 = vunpack.i.l.bf16 %v2635_v59  ;;  %v1141_v9 = vpack.c.bf16 %v1132_v2, %v1129_v40  ;;  %v1101_v26 = vsel %vm874_vm0, %v2642_v62, %v2622_v13 }
 0x199   : > { %v2650_v4 = vpop.permute.xlu1 %2649  ;;  %2441 = vmatpush3.bf16.msra.mxu1 %v1142_v22  ;;  %v1140_v30 = vpack.c.bf16 %v1131_v11, %v3343_v41  ;;  %v1102_v21 = vsel %vm874_vm0, %v2622_v13, %v2641_v3  ;;  %v2781_v20 = vmov 1966171168   ;;  %v3401_v56 = vshrl.u32 %v1270_v53, 7 }
 0x19a   : > { %v1090_v16 = vsel %vm862_vm1, %v2637_v63, %v2577_v19  ;;  %952 = vmatpush1.bf16.msra.mxu0 %v939_v6  ;;  %2442 = vmatprep.subr.bf16.mxu1 %v2757_v0  ;;  %v2652_v57 = vunpack.i.h.bf16 %v2650_v4  ;;  %v2651_v18 = vunpack.i.l.bf16 %v2650_v4  ;;  %v1091_v25 = vsel %vm862_vm1, %v2577_v19, %v2636_v1 }
 0x19b   : > { %v2645_v23 = vpop.permute.xlu0 %2644  ;;  %1172 = vmatprep.subr.bf16.mxu0 %v1141_v9  ;;  %v1136_v31 = vsel %vm904_vm11, %v2631_v58, %v2636_v1  ;;  %v1135_v32 = vsel %vm904_vm11, %v1080_v24, %v1091_v25  ;;  %v1134_v34 = vsel %vm904_vm11, %v1079_v15, %v1090_v16  ;;  %v1268_v52 = vunpack.c.l.s4 %v2781_v20 }
 0x19c   : > { %v2647_v28 = vunpack.i.h.bf16 %v2645_v23  ;;  %v2646_v27 = vunpack.i.l.bf16 %v2645_v23  ;;  %v1123_v41 = vsel %vm898_vm4, %v2651_v18, %v2652_v57 }
 0x19d   : > { %2409 = vmatmul.mubr.msk.bf16.vlgmr.msra.gmra.mrb[0].mxu0 %vm933_vm5, %v926_v7  ;;  %v1269_v55 = vunpack.c.0.s8 %v1268_v52 }
 0x19e   : > { %v1112_v35 = vsel %vm886_vm2, %v2647_v28, %v2582_v12  ;;  %v1139_v36 = vsel %vm904_vm11, %v2641_v3, %v2646_v27  ;;  %1173 = vmatpush1.bf16.msra.mxu0 %v1140_v30  ;;  %v1113_v8 = vsel %vm886_vm2, %v2582_v12, %v2646_v27  ;;  %1204 = vmatprep.mubr.bf16.mxu0 %v2780_v10 }
 0x19f   : > { %v1122_v37 = vpop.permute.xlu0 %1121  ;;  %v1145_v29 = vpack.c.bf16 %v1139_v36, %v1136_v31  ;;  %v1138_v39 = vsel %vm904_vm11, %v1102_v21, %v1113_v8  ;;  %v1137_v40 = vsel %vm904_vm11, %v1101_v26, %v1112_v35  ;;  %v1146_v10 = vpack.c.bf16 %v1123_v41, %v1123_v41 }
 0x1a0   : > { %v1124_v17 = vsel %vm898_vm4, %v2652_v57, %v1122_v37  ;;  %v1148_v33 = vpack.c.bf16 %v1122_v37, %v1122_v37  ;;  %v1144_v43 = vpack.c.bf16 %v1138_v39, %v1135_v32  ;;  %v1143_v14 = vpack.c.bf16 %v1137_v40, %v1134_v34 }
 0x1a1   : > { %v1147_v44 = vpack.c.bf16 %v1124_v17, %v1124_v17  ;;  %2443 = vmatpush3.bf16.msra.mxu1 %v1145_v29  ;;  %v1164_v48 = vsel %vm937_vm3, %v1146_v10, 0  ;;  %v3404_v61 = vsub.s32 %v1269_v55, %v3401_v56  ;;  %v3410_v57 = vsub.s32 0, %v3401_v56 }
 0x1a2   : > { %1174 = vmatprep.subr.bf16.mxu0 %v1144_v43  ;;  %2444 = vmatprep.subr.bf16.mxu1 %v2757_v0  ;;  %v1170_v5 = vsel %vm937_vm3, %v1148_v33, 0 }
 0x1a3   : > { %1175 = vmatpush1.bf16.msra.mxu0 %v1143_v14 }
 0x1a4   : > { %2412 = vmatprep.subr.msk.bf16.mxu0 %vm937_vm3, %v1147_v44 }
 0x1a5   : > { %2445 = vmatpush3.bf16.msra.mxu1 %v1170_v5 }
 0x1a7   : > { %1177 = vmatpush1.bf16.msra.mxu0 %v1164_v48 }
 0x1a8   : > { %2447 = vmatmul.mubr.msk.bf16.vlgmr.msra.gmra.mrb[4].mxu1 %vm933_vm5, %v1159_v45 }
 0x1aa   : > { %2413 = vmatmul.mubr.msk.bf16.vlgmr.msra.gmra.mrb[4].mxu0 %vm933_vm5, %v1159_v45  ;;  %v931_v47 = vpop.permute.xlu1 %930 }
 0x1b0   : > { %v1154_v54 = vpop.permute.xlu0 %1153 }
 0x269   : > { %v1022_v7 = vpop.f32.mrb[0].mxu1 }
 0x26a   : > { %v2438_v49 = vpop.f32.mrb[1].mxu1  ;;  %v1023_v63 = vadd.f32 %v1022_v7, %v931_v47 }
 0x26b   : > { %v1025_v50 = vpop.f32.mrb[2].mxu1 }
 0x26c   : > { %v2439_v46 = vpop.f32.mrb[3].mxu1 }
 0x270   : > { %v981_v0 = vpop.f32.mrb[0].mxu0 }
 0x271   : > { %v983_v51 = vpop.f32.mrb[1].mxu0  ;;  %v982_v11 = vadd.f32 %v981_v0, %v931_v47 }
 0x272   : > { %v985_v19 = vpop.f32.mrb[2].mxu0  ;;  %v984_v16 = vadd.f32 %v983_v51, %v931_v47 }
 0x273   : > { %v986_v38 = vpop.f32.mrb[3].mxu0 }
 0x274   : > { %v3479_v38 = vsub.s32 1, %v3401_v56 }
 0x27b   : > { %v1247_v58 = vpop.f32.mrb[4].mxu1 }
 0x27c   : > { %v1248_v59 = vadd.f32 %v1247_v58, %v1154_v54  ;;  %v2448_v22 = vpop.f32.mrb[5].mxu1 }
 0x27d   : > { %v1206_v60 = vpop.f32.mrb[4].mxu0  ;;  %v1250_v62 = vpop.f32.mrb[6].mxu1 }
 0x27e   : > { %v1258_v1 = vrot.slane %v1248_v59, 4  ;;  %v1207_v2 = vadd.f32 %v1206_v60, %v1154_v54  ;;  %v1208_v3 = vpop.f32.mrb[5].mxu0  ;;  %v2449_v4 = vpop.f32.mrb[7].mxu1 }
 0x27f   : > { %v1209_v6 = vadd.f32 %v1208_v3, %v1154_v54  ;;  %v1210_v9 = vpop.f32.mrb[6].mxu0 }
 0x280   : > { %v3407_v12 = vsel %vm904_vm11, %v1023_v63, %v1258_v1  ;;  %v1256_v13 = vrot.slane %v1207_v2, 4  ;;  %v1211_v15 = vpop.f32.mrb[7].mxu0 }
 0x281   : > { %v1257_v18 = vrot.slane %v1209_v6, 4  ;;  %v2180_v23 = vrot.slane %v3407_v12, %v3404_v61  ;;  %v2173_v24 = vcombine.high %v3407_v12, %v3407_v12 }
 0x282   : > { %v1262_v25 = vsel %vm904_vm11, %v982_v11, %v1256_v13 }
 0x283   : > { %v1266_v26 = vcombine.high %v1262_v25, %v1262_v25  ;;  %v1273_v28 = vrot.slane %v1262_v25, %v3404_v61  ;;  %v1263_v27 = vsel %vm904_vm11, %v984_v16, %v1257_v18  ;;  %v2196_v30 = vrot.slane %v2180_v23, %v3404_v61 }
 0x284   : > { %v1728_v31 = vcombine.high %v1263_v27, %v1263_v27  ;;  %v1735_v21 = vrot.slane %v1263_v27, %v3404_v61  ;;  %v2188_v32 = vcombine.high %v2180_v23, %v2180_v23  ;;  %v2187_v39 = vrot.slane %v2173_v24, %v3404_v61 }
 0x285   : > { %v1280_v34 = vrot.slane %v1266_v26, %v3404_v61  ;;  %v1281_v35 = vcombine.high %v1273_v28, %v1273_v28  ;;  %v1289_v36 = vrot.slane %v1273_v28, %v3404_v61  ;;  %v2225_v8 = vrot.slane %v2196_v30, %v3410_v57 }
 0x286   : > { %v3425_v37 = vrot.slane %v1728_v31, %v3404_v61  ;;  %v2210_v29 = vrot.slane %v2188_v32, %v3404_v61  ;;  %v3457_v10 = vrot.slane %v1735_v21, %v3404_v61  ;;  %v2218_v5 = vcombine.high %v2196_v30, %v2196_v30 }
 0x287   : > { %v1282_v40 = vcombine.high %v1280_v34, %v1280_v34  ;;  %v1296_v41 = vrot.slane %v1280_v34, %v3404_v61  ;;  %v1303_v42 = vrot.slane %v1281_v35, %v3404_v61  ;;  %v3431_v17 = vcombine.high %v1289_v36, %v1289_v36  ;;  %1324 = vst.msk [vmem:[%s3435_s28] sm:$0x1] %vm1323_vm6, %v1289_v36 }
 0x288   : > { %2254 = vrot.lane.b32.xlu0 %v2225_v8, %s2782_s11  ;;  %v3442_v33 = vrot.slane %v3425_v37, %v3404_v61  ;;  %v2229_v45 = vrot.slane %v2210_v29, %v3410_v57  ;;  %v2220_v48 = vcombine.high %v2210_v29, %v2210_v29  ;;  %v1743_v7 = vcombine.high %v1735_v21, %v1735_v21 }
 0x289   : > { %v3445_v43 = vrot.slane %v1282_v40, %v3404_v61  ;;  %v3447_v14 = vcombine.high %v1296_v41, %v1296_v41  ;;  %v1313_v44 = vcombine.high %v1303_v42, %v1303_v42  ;;  %1325 = vst.msk [vmem:[%s3435_s28 + $0x10] sm:$0x1] %vm1323_vm6, %v1303_v42  ;;  %1326 = vst.msk [vmem:[%s3435_s28 + $0x20] sm:$0x1] %vm1323_vm6, %v3431_v17 }
 0x28a   : > { %1328 = vst.msk [vmem:[%s3435_s28 + $0x40] sm:$0x1] %vm1323_vm6, %v1296_v41  ;;  %v3469_v49 = vrot.slane %v2187_v39, %v3404_v61  ;;  %v2189_v50 = vcombine.high %v2187_v39, %v2187_v39  ;;  %v1557_v46 = vcombine.low %v1262_v25, %v1263_v27  ;;  %v3472_v0 = vrot.slane %v1289_v36, %v3410_v57 }
 0x28b   : > { %1327 = vst.msk [vmem:[%s3435_s28 + $0x30] sm:$0x1] %vm1323_vm6, %v1313_v44  ;;  %1329 = vst.msk [vmem:[%s3435_s28 + $0x50] sm:$0x1] %vm1323_vm6, %v3445_v43  ;;  %v1744_v51 = vcombine.high %v3425_v37, %v3425_v37  ;;  %2256 = vrot.lane.b32.xlu1 %v2229_v45, %s2782_s11  ;;  %v2233_v19 = vrot.slane %v2218_v5, %v3410_v57  ;;  %v1773_v20 = vcombine.high %v3457_v10, %v3457_v10 }
 0x28c   : > { %1330 = vst.msk [vmem:[%s3435_s28 + $0x60] sm:$0x1] %vm1323_vm6, %v3447_v14  ;;  %v2237_v52 = vrot.slane %v2220_v48, %v3410_v57  ;;  %v1565_v53 = vrot.slane %v1557_v46, %v3404_v61  ;;  %v1558_v54 = vcombine.high %v1262_v25, %v1263_v27  ;;  %v3487_v55 = vrot.slane %v2189_v50, %v3404_v61 }
 0x28d   : > { %2258 = vrot.lane.b32.xlu0 %v2233_v19, %s2782_s11  ;;  %v3490_v47 = vrot.slane %v1296_v41, %v3410_v57  ;;  %v2002_v58 = vcombine.low %v1263_v27, %v3407_v12  ;;  %v2003_v56 = vcombine.high %v1263_v27, %v3407_v12  ;;  %v3495_v59 = vrot.slane %v1743_v7, %v3404_v61 }
 0x28e   : > { %v2241_v22 = vrot.slane %v3469_v49, %v3410_v57  ;;  %v1573_v60 = vcombine.high %v1565_v53, %v1565_v53  ;;  %v3500_v62 = vrot.slane %v1565_v53, %v3404_v61  ;;  %v1572_v63 = vrot.slane %v1558_v54, %v3404_v61 }
 0x28f   : > { %2260 = vrot.lane.b32.xlu1 %v2237_v52, %s2782_s11  ;;  %v2010_v1 = vrot.slane %v2002_v58, %v3404_v61  ;;  %v2017_v2 = vrot.slane %v2003_v56, %v3404_v61  ;;  %v3507_v3 = vrot.slane %v1313_v44, %v3410_v57  ;;  %v3510_v4 = vrot.slane %v1303_v42, %v3410_v57 }
 0x290   : > { %v3514_v6 = vrot.slane %v3445_v43, %v3410_v57  ;;  %v1610_v9 = vrot.slane %v3500_v62, %v3410_v57  ;;  %v3519_v11 = vrot.slane %v1773_v20, %v3410_v57  ;;  %v2245_v12 = vrot.slane %v3487_v55, %v3410_v57 }
 0x291   : > { %2262 = vrot.lane.b32.xlu0 %v2241_v22, %s2782_s11  ;;  %v1574_v13 = vcombine.high %v1572_v63, %v1572_v63  ;;  %v3525_v15 = vrot.slane %v1572_v63, %v3404_v61  ;;  %v3528_v16 = vrot.slane %v2010_v1, %v3404_v61  ;;  %v2219_v18 = vcombine.high %v3469_v49, %v3469_v49 }
 0x292   : > { %v3533_v23 = vrot.slane %v2017_v2, %v3404_v61  ;;  %v3537_v24 = vrot.slane %v3442_v33, %v3410_v57  ;;  %v3540_v25 = vrot.slane %v1573_v60, %v3404_v61  ;;  %v2221_v26 = vcombine.high %v3487_v55, %v3487_v55 }
 0x293   : > { %2264 = vrot.lane.b32.xlu1 %v2245_v12, %s2782_s11  ;;  %v2018_v28 = vcombine.high %v2010_v1, %v2010_v1  ;;  %v1642_v27 = vrot.slane %v3525_v15, %v3410_v57  ;;  %v3549_v30 = vcombine.high %v3500_v62, %v3500_v62  ;;  %v2019_v31 = vcombine.high %v2017_v2, %v2017_v2 }
 0x294   : > { %v1622_v21 = vrot.slane %v3540_v25, %v3479_v38  ;;  %v3554_v32 = vrot.slane %v1574_v13, %v3404_v61  ;;  %v3558_v34 = vcombine.high %v3525_v15, %v3525_v15  ;;  %v1775_v36 = vcombine.high %v3495_v59, %v3495_v59 }
 0x295   : > { %1396 = vrot.lane.b32.xlu0 %v3472_v0, %s2776_s7  ;;  %v1630_v35 = vrot.slane %v3549_v30, %v3479_v38  ;;  %v1772_v8 = vrot.slane %v1744_v51, %v3404_v61  ;;  %v2055_v37 = vrot.slane %v3528_v16, %v3410_v57  ;;  %v2087_v40 = vrot.slane %v3533_v23, %v3410_v57 }
 0x296   : > { %v1654_v29 = vrot.slane %v3554_v32, %v3479_v38  ;;  %v1662_v39 = vrot.slane %v3558_v34, %v3479_v38  ;;  %v3577_v41 = vrot.slane %v3447_v14, %v3410_v57  ;;  %v3582_v42 = vrot.slane %v1775_v36, %v3410_v57 }
 0x297   : > { %1364 = vrot.lane.b32.xlu1 %v3472_v0, %s2777_s8  ;;  %v3585_v44 = vrot.slane %v1772_v8, %v3410_v57  ;;  %v3588_v45 = vrot.slane %v2018_v28, %v3404_v61  ;;  %v3592_v5 = vcombine.high %v3528_v16, %v3528_v16  ;;  %v1618_v14 = vrot.slane %v3540_v25, %v3410_v57 }
 0x298   : > { %v3597_v48 = vrot.slane %v2019_v31, %v3404_v61  ;;  %v1626_v7 = vrot.slane %v3549_v30, %v3410_v57  ;;  %v3603_v49 = vcombine.high %v3533_v23, %v3533_v23  ;;  %v1650_v61 = vrot.slane %v3554_v32, %v3410_v57 }
 0x299   : > { %1428 = vrot.lane.b32.xlu0 %v3472_v0, %s2783_s9  ;;  %v2067_v50 = vrot.slane %v3588_v45, %v3479_v38  ;;  %v2075_v46 = vrot.slane %v3592_v5, %v3479_v38  ;;  %v1658_v51 = vrot.slane %v3558_v34, %v3410_v57  ;;  %v1774_v52 = vcombine.high %v3442_v33, %v3442_v33 }
 0x29a   : > { %v2099_v19 = vrot.slane %v3597_v48, %v3479_v38  ;;  %v2107_v20 = vrot.slane %v3603_v49, %v3479_v38  ;;  %v1314_v53 = vcombine.high %v3445_v43, %v3445_v43  ;;  %v2063_v54 = vrot.slane %v3588_v45, %v3410_v57 }
 0x29b   : > { %1366 = vrot.lane.b32.xlu1 %v3510_v4, %s2777_s8  ;;  %v2071_v55 = vrot.slane %v3592_v5, %v3410_v57  ;;  %v3631_v58 = vcombine.high %v3540_v25, %v3540_v25  ;;  %v2095_v56 = vrot.slane %v3597_v48, %v3410_v57  ;;  %v3636_v33 = vrot.slane %v1774_v52, %v3410_v57 }
 0x29c   : > { %v3639_v43 = vrot.slane %v1314_v53, %v3410_v57  ;;  %1331 = vst.msk [vmem:[%s3435_s28 + $0x70] sm:$0x1] %vm1323_vm6, %v1314_v53  ;;  %v3645_v22 = vcombine.high %v3554_v32, %v3554_v32  ;;  %v2103_v60 = vrot.slane %v3603_v49, %v3410_v57  ;;  %v1776_v1 = vcombine.high %v1772_v8, %v1772_v8 }
 0x29d   : > { %1460 = vrot.lane.b32.xlu0 %v3472_v0, %s2784_s4  ;;  %v1638_v63 = vrot.slane %v3631_v58, %v3479_v38  ;;  %v3657_v12 = vcombine.high %v3588_v45, %v3588_v45  ;;  %v3665_v31 = vcombine.high %v3597_v48, %v3597_v48  ;;  %v3668_v36 = vrot.slane %v2219_v18, %v3410_v57 }
 0x29e   : > { %v1670_v13 = vrot.slane %v3645_v22, %v3479_v38  ;;  %v3673_v8 = vrot.slane %v1776_v1, %v3410_v57  ;;  %v3680_v28 = vrot.slane %v2221_v26, %v3410_v57  ;;  %v1780_v26 = vrot.slane %v3457_v10, %v3410_v57 }
 0x29f   : > { %1398 = vrot.lane.b32.xlu1 %v3510_v4, %s2776_s7  ;;  %v2079_v52 = vrot.slane %v3657_v12, %v3410_v57  ;;  %v2083_v53 = vrot.slane %v3657_v12, %v3479_v38  ;;  %v2111_v2 = vrot.slane %v3665_v31, %v3410_v57  ;;  %v2115_v18 = vrot.slane %v3665_v31, %v3479_v38 }
 0x2a0   : > { %v1646_v10 = vrot.slane %v3525_v15, %v3479_v38  ;;  %v1343_v1 = vrot.slane %v3431_v17, %v3410_v57  ;;  %v2059_v17 = vrot.slane %v3528_v16, %v3479_v38  ;;  %v4323_v49 = vrot.slane %v3631_v58, %v3410_v57 }
 0x2a1   : > { %1492 = vrot.lane.b32.xlu0 %v3472_v0, %s2785_s6 }
 0x2a3   : > { %1430 = vrot.lane.b32.xlu1 %v3510_v4, %s2783_s9 }
 0x2a5   : > { %1524 = vrot.lane.b32.xlu0 %v3472_v0, %s2786_s17  ;;  %v1614_v0 = vrot.slane %v3500_v62, %v3479_v38 }
 0x2a7   : > { %1462 = vrot.lane.b32.xlu1 %v3510_v4, %s2784_s4 }
 0x2a9   : > { %1809 = vrot.lane.b32.xlu0 %v1780_v26, %s2787_s19 }
 0x2ab   : > { %1494 = vrot.lane.b32.xlu1 %v3510_v4, %s2785_s6 }
 0x2ad   : > { %1841 = vrot.lane.b32.xlu0 %v1780_v26, %s2788_s23 }
 0x2af   : > { %1526 = vrot.lane.b32.xlu1 %v3510_v4, %s2786_s17  ;;  %v1784_v4 = vrot.slane %v3495_v59, %v3410_v57  ;;  %v2091_v59 = vrot.slane %v3533_v23, %v3479_v38 }
 0x2b1   : > { %1873 = vrot.lane.b32.xlu0 %v1780_v26, %s2789_s20 }
 0x2b3   : > { %1673 = vrot.lane.b32.xlu1 %v1614_v0, %s2790_s22 }
 0x2b5   : > { %1905 = vrot.lane.b32.xlu0 %v1780_v26, %s2791_s26 }
 0x2b7   : > { %1689 = vrot.lane.b32.xlu1 %v1646_v10, %s2790_s22 }
 0x2b9   : > { %1937 = vrot.lane.b32.xlu0 %v1780_v26, %s2792_s27 }
 0x2bb   : > { %1811 = vrot.lane.b32.xlu1 %v1784_v4, %s2787_s19 }
 0x2bd   : > { %1969 = vrot.lane.b32.xlu0 %v1780_v26, %s2793_s29 }
 0x2bf   : > { %1843 = vrot.lane.b32.xlu1 %v1784_v4, %s2788_s23 }
 0x2c1   : > { %1368 = vrot.lane.b32.xlu0 %v1343_v1, %s2777_s8 }
 0x2c3   : > { %1875 = vrot.lane.b32.xlu1 %v1784_v4, %s2789_s20 }
 0x2c5   : > { %1372 = vrot.lane.b32.xlu0 %v3490_v47, %s2777_s8 }
 0x2c7   : > { %1907 = vrot.lane.b32.xlu1 %v1784_v4, %s2791_s26 }
 0x2c9   : > { %1400 = vrot.lane.b32.xlu0 %v1343_v1, %s2776_s7 }
 0x2cb   : > { %1939 = vrot.lane.b32.xlu1 %v1784_v4, %s2792_s27 }
 0x2cd   : > { %1404 = vrot.lane.b32.xlu0 %v3490_v47, %s2776_s7 }
 0x2cf   : > { %1971 = vrot.lane.b32.xlu1 %v1784_v4, %s2793_s29 }
 0x2d1   : > { %1432 = vrot.lane.b32.xlu0 %v1343_v1, %s2783_s9 }
 0x2d3   : > { %2118 = vrot.lane.b32.xlu1 %v2059_v17, %s2794_s30 }
 0x2d5   : > { %1436 = vrot.lane.b32.xlu0 %v3490_v47, %s2783_s9 }
 0x2d7   : > { %2134 = vrot.lane.b32.xlu1 %v2091_v59, %s2794_s30 }
 0x2d9   : > { %1464 = vrot.lane.b32.xlu0 %v1343_v1, %s2784_s4 }
 0x2db   : > { %1370 = vrot.lane.b32.xlu1 %v3507_v3, %s2777_s8 }
 0x2dd   : > { %1468 = vrot.lane.b32.xlu0 %v3490_v47, %s2784_s4 }
 0x2df   : > { %1374 = vrot.lane.b32.xlu1 %v3514_v6, %s2777_s8 }
 0x2e1   : > { %1496 = vrot.lane.b32.xlu0 %v1343_v1, %s2785_s6 }
 0x2e3   : > { %1402 = vrot.lane.b32.xlu1 %v3507_v3, %s2776_s7 }
 0x2e5   : > { %1500 = vrot.lane.b32.xlu0 %v3490_v47, %s2785_s6 }
 0x2e7   : > { %1406 = vrot.lane.b32.xlu1 %v3514_v6, %s2776_s7 }
 0x2e9   : > { %1528 = vrot.lane.b32.xlu0 %v1343_v1, %s2786_s17 }
 0x2eb   : > { %1434 = vrot.lane.b32.xlu1 %v3507_v3, %s2783_s9 }
 0x2ed   : > { %1532 = vrot.lane.b32.xlu0 %v3490_v47, %s2786_s17 }
 0x2ef   : > { %1438 = vrot.lane.b32.xlu1 %v3514_v6, %s2783_s9 }
 0x2f1   : > { %1671 = vrot.lane.b32.xlu0 %v1610_v9, %s2790_s22 }
 0x2f3   : > { %1466 = vrot.lane.b32.xlu1 %v3507_v3, %s2784_s4 }
 0x2f5   : > { %1687 = vrot.lane.b32.xlu0 %v1642_v27, %s2790_s22 }
 0x2f7   : > { %1470 = vrot.lane.b32.xlu1 %v3514_v6, %s2784_s4 }
 0x2f9   : > { %1813 = vrot.lane.b32.xlu0 %v3519_v11, %s2787_s19 }
 0x2fa   : > { %v2255_v47 = vpop.permute.xlu0 %2254 }
 0x2fb   : > { %2278 = vst.msk [vmem:[%s3435_s28 + $0xf] sm:$0x1] %vm1323_vm6, %v2255_v47  ;;  %1498 = vrot.lane.b32.xlu1 %v3507_v3, %s2785_s6 }
 0x2fd   : > { %v2257_v62 = vpop.permute.xlu1 %2256  ;;  %1817 = vrot.lane.b32.xlu0 %v3537_v24, %s2787_s19 }
 0x2fe   : > { %2279 = vst.msk [vmem:[%s3435_s28 + $0x1f] sm:$0x1] %vm1323_vm6, %v2257_v62 }
 0x2ff   : > { %v2259_v9 = vpop.permute.xlu0 %2258  ;;  %1502 = vrot.lane.b32.xlu1 %v3514_v6, %s2785_s6 }
 0x300   : > { %2280 = vst.msk [vmem:[%s3435_s28 + $0x2f] sm:$0x1] %vm1323_vm6, %v2259_v9 }
 0x301   : > { %v2261_v15 = vpop.permute.xlu1 %2260  ;;  %1845 = vrot.lane.b32.xlu0 %v3519_v11, %s2788_s23 }
 0x302   : > { %2281 = vst.msk [vmem:[%s3435_s28 + $0x3f] sm:$0x1] %vm1323_vm6, %v2261_v15 }
 0x303   : > { %v2263_v27 = vpop.permute.xlu0 %2262  ;;  %1530 = vrot.lane.b32.xlu1 %v3507_v3, %s2786_s17 }
 0x304   : > { %2282 = vst.msk [vmem:[%s3435_s28 + $0x4f] sm:$0x1] %vm1323_vm6, %v2263_v27 }
 0x305   : > { %v2265_v26 = vpop.permute.xlu1 %2264  ;;  %1849 = vrot.lane.b32.xlu0 %v3537_v24, %s2788_s23 }
 0x306   : > { %2283 = vst.msk [vmem:[%s3435_s28 + $0x5f] sm:$0x1] %vm1323_vm6, %v2265_v26 }
 0x307   : > { %v1397_v0 = vpop.permute.xlu0 %1396  ;;  %1534 = vrot.lane.b32.xlu1 %v3514_v6, %s2786_s17 }
 0x308   : > { %1420 = vst.msk [vmem:[%s3435_s28 + $0x2] sm:$0x1] %vm1323_vm6, %v1397_v0 }
 0x309   : > { %v1365_v10 = vpop.permute.xlu1 %1364  ;;  %1877 = vrot.lane.b32.xlu0 %v3519_v11, %s2789_s20 }
 0x30a   : > { %1388 = vst.msk [vmem:[%s3435_s28 + $0x1] sm:$0x1] %vm1323_vm6, %v1365_v10 }
 0x30b   : > { %v1429_v3 = vpop.permute.xlu0 %1428  ;;  %1677 = vrot.lane.b32.xlu1 %v1622_v21, %s2790_s22 }
 0x30c   : > { %1452 = vst.msk [vmem:[%s3435_s28 + $0x3] sm:$0x1] %vm1323_vm6, %v1429_v3 }
 0x30d   : > { %v1367_v6 = vpop.permute.xlu1 %1366  ;;  %1881 = vrot.lane.b32.xlu0 %v3537_v24, %s2789_s20 }
 0x30e   : > { %1389 = vst.msk [vmem:[%s3435_s28 + $0x11] sm:$0x1] %vm1323_vm6, %v1367_v6 }
 0x30f   : > { %v1461_v4 = vpop.permute.xlu0 %1460  ;;  %1681 = vrot.lane.b32.xlu1 %v1630_v35, %s2790_s22 }
 0x310   : > { %1484 = vst.msk [vmem:[%s3435_s28 + $0x4] sm:$0x1] %vm1323_vm6, %v1461_v4 }
 0x311   : > { %v1399_v21 = vpop.permute.xlu1 %1398  ;;  %1909 = vrot.lane.b32.xlu0 %v3519_v11, %s2791_s26 }
 0x312   : > { %1421 = vst.msk [vmem:[%s3435_s28 + $0x12] sm:$0x1] %vm1323_vm6, %v1399_v21 }
 0x313   : > { %v1493_v1 = vpop.permute.xlu0 %1492  ;;  %1693 = vrot.lane.b32.xlu1 %v1654_v29, %s2790_s22 }
 0x314   : > { %1516 = vst.msk [vmem:[%s3435_s28 + $0x5] sm:$0x1] %vm1323_vm6, %v1493_v1 }
 0x315   : > { %v1431_v35 = vpop.permute.xlu1 %1430  ;;  %1913 = vrot.lane.b32.xlu0 %v3537_v24, %s2791_s26 }
 0x316   : > { %1453 = vst.msk [vmem:[%s3435_s28 + $0x13] sm:$0x1] %vm1323_vm6, %v1431_v35 }
 0x317   : > { %v1525_v17 = vpop.permute.xlu0 %1524  ;;  %1697 = vrot.lane.b32.xlu1 %v1662_v39, %s2790_s22 }
 0x318   : > { %1548 = vst.msk [vmem:[%s3435_s28 + $0x6] sm:$0x1] %vm1323_vm6, %v1525_v17 }
 0x319   : > { %v1463_v29 = vpop.permute.xlu1 %1462  ;;  %1941 = vrot.lane.b32.xlu0 %v3519_v11, %s2792_s27 }
 0x31a   : > { %1485 = vst.msk [vmem:[%s3435_s28 + $0x14] sm:$0x1] %vm1323_vm6, %v1463_v29 }
 0x31b   : > { %v1810_v59 = vpop.permute.xlu0 %1809  ;;  %1815 = vrot.lane.b32.xlu1 %v3582_v42, %s2787_s19 }
 0x31c   : > { %1833 = vst.msk [vmem:[%s3435_s28 + $0x8] sm:$0x1] %vm1323_vm6, %v1810_v59 }
 0x31d   : > { %v1495_v47 = vpop.permute.xlu1 %1494  ;;  %1945 = vrot.lane.b32.xlu0 %v3537_v24, %s2792_s27 }
 0x31e   : > { %1517 = vst.msk [vmem:[%s3435_s28 + $0x15] sm:$0x1] %vm1323_vm6, %v1495_v47 }
 0x31f   : > { %v1842_v39 = vpop.permute.xlu0 %1841  ;;  %1819 = vrot.lane.b32.xlu1 %v3585_v44, %s2787_s19 }
 0x320   : > { %1865 = vst.msk [vmem:[%s3435_s28 + $0x9] sm:$0x1] %vm1323_vm6, %v1842_v39 }
 0x321   : > { %v1527_v62 = vpop.permute.xlu1 %1526  ;;  %2116 = vrot.lane.b32.xlu0 %v2055_v37, %s2794_s30 }
 0x322   : > { %1549 = vst.msk [vmem:[%s3435_s28 + $0x16] sm:$0x1] %vm1323_vm6, %v1527_v62 }
 0x323   : > { %v1874_v9 = vpop.permute.xlu0 %1873  ;;  %1847 = vrot.lane.b32.xlu1 %v3582_v42, %s2788_s23 }
 0x324   : > { %1897 = vst.msk [vmem:[%s3435_s28 + $0xa] sm:$0x1] %vm1323_vm6, %v1874_v9 }
 0x325   : > { %v3866_v15 = vpop.permute.xlu1 %1673  ;;  %2132 = vrot.lane.b32.xlu0 %v2087_v40, %s2794_s30 }
 0x327   : > { %v1906_v27 = vpop.permute.xlu0 %1905  ;;  %1851 = vrot.lane.b32.xlu1 %v3585_v44, %s2788_s23 }
 0x328   : > { %1929 = vst.msk [vmem:[%s3435_s28 + $0xb] sm:$0x1] %vm1323_vm6, %v1906_v27 }
 0x329   : > { %v3876_v16 = vpop.permute.xlu1 %1689  ;;  %1973 = vrot.lane.b32.xlu0 %v3519_v11, %s2793_s29 }
 0x32b   : > { %v1938_v37 = vpop.permute.xlu0 %1937  ;;  %1879 = vrot.lane.b32.xlu1 %v3582_v42, %s2789_s20 }
 0x32c   : > { %1961 = vst.msk [vmem:[%s3435_s28 + $0xc] sm:$0x1] %vm1323_vm6, %v1938_v37 }
 0x32d   : > { %v1812_v23 = vpop.permute.xlu1 %1811  ;;  %1977 = vrot.lane.b32.xlu0 %v3537_v24, %s2793_s29 }
 0x32e   : > { %1834 = vst.msk [vmem:[%s3435_s28 + $0x18] sm:$0x1] %vm1323_vm6, %v1812_v23 }
 0x32f   : > { %v1970_v40 = vpop.permute.xlu0 %1969  ;;  %1883 = vrot.lane.b32.xlu1 %v3585_v44, %s2789_s20 }
 0x330   : > { %1993 = vst.msk [vmem:[%s3435_s28 + $0xd] sm:$0x1] %vm1323_vm6, %v1970_v40 }
 0x331   : > { %v1844_v11 = vpop.permute.xlu1 %1843  ;;  %1376 = vrot.lane.b32.xlu0 %v3577_v41, %s2777_s8 }
 0x332   : > { %1866 = vst.msk [vmem:[%s3435_s28 + $0x19] sm:$0x1] %vm1323_vm6, %v1844_v11 }
 0x333   : > { %v1369_v26 = vpop.permute.xlu0 %1368  ;;  %1911 = vrot.lane.b32.xlu1 %v3582_v42, %s2791_s26 }
 0x334   : > { %1390 = vst.msk [vmem:[%s3435_s28 + $0x21] sm:$0x1] %vm1323_vm6, %v1369_v26 }
 0x335   : > { %v1876_v24 = vpop.permute.xlu1 %1875  ;;  %1408 = vrot.lane.b32.xlu0 %v3577_v41, %s2776_s7 }
 0x336   : > { %1898 = vst.msk [vmem:[%s3435_s28 + $0x1a] sm:$0x1] %vm1323_vm6, %v1876_v24 }
 0x337   : > { %v1373_v0 = vpop.permute.xlu0 %1372  ;;  %1915 = vrot.lane.b32.xlu1 %v3585_v44, %s2791_s26 }
 0x338   : > { %1392 = vst.msk [vmem:[%s3435_s28 + $0x41] sm:$0x1] %vm1323_vm6, %v1373_v0 }
 0x339   : > { %v1908_v10 = vpop.permute.xlu1 %1907  ;;  %1440 = vrot.lane.b32.xlu0 %v3577_v41, %s2783_s9 }
 0x33a   : > { %1930 = vst.msk [vmem:[%s3435_s28 + $0x1b] sm:$0x1] %vm1323_vm6, %v1908_v10 }
 0x33b   : > { %v1401_v3 = vpop.permute.xlu0 %1400  ;;  %1943 = vrot.lane.b32.xlu1 %v3582_v42, %s2792_s27 }
 0x33c   : > { %1422 = vst.msk [vmem:[%s3435_s28 + $0x22] sm:$0x1] %vm1323_vm6, %v1401_v3 }
 0x33d   : > { %v1940_v6 = vpop.permute.xlu1 %1939  ;;  %1472 = vrot.lane.b32.xlu0 %v3577_v41, %s2784_s4 }
 0x33e   : > { %1962 = vst.msk [vmem:[%s3435_s28 + $0x1c] sm:$0x1] %vm1323_vm6, %v1940_v6 }
 0x33f   : > { %v1405_v4 = vpop.permute.xlu0 %1404  ;;  %1947 = vrot.lane.b32.xlu1 %v3585_v44, %s2792_s27 }
 0x340   : > { %1424 = vst.msk [vmem:[%s3435_s28 + $0x42] sm:$0x1] %vm1323_vm6, %v1405_v4 }
 0x341   : > { %v1972_v21 = vpop.permute.xlu1 %1971  ;;  %1504 = vrot.lane.b32.xlu0 %v3577_v41, %s2785_s6 }
 0x342   : > { %1994 = vst.msk [vmem:[%s3435_s28 + $0x1d] sm:$0x1] %vm1323_vm6, %v1972_v21 }
 0x343   : > { %v1433_v1 = vpop.permute.xlu0 %1432  ;;  %2122 = vrot.lane.b32.xlu1 %v2067_v50, %s2794_s30 }
 0x344   : > { %1454 = vst.msk [vmem:[%s3435_s28 + $0x23] sm:$0x1] %vm1323_vm6, %v1433_v1 }
 0x345   : > { %v3934_v35 = vpop.permute.xlu1 %2118  ;;  %1536 = vrot.lane.b32.xlu0 %v3577_v41, %s2786_s17 }
 0x347   : > { %v1437_v17 = vpop.permute.xlu0 %1436  ;;  %2126 = vrot.lane.b32.xlu1 %v2075_v46, %s2794_s30 }
 0x348   : > { %1456 = vst.msk [vmem:[%s3435_s28 + $0x43] sm:$0x1] %vm1323_vm6, %v1437_v17 }
 0x349   : > { %v3944_v29 = vpop.permute.xlu1 %2134  ;;  %1675 = vrot.lane.b32.xlu0 %v1618_v14, %s2790_s22 }
 0x34b   : > { %v1465_v50 = vpop.permute.xlu0 %1464  ;;  %2138 = vrot.lane.b32.xlu1 %v2099_v19, %s2794_s30 }
 0x34c   : > { %1486 = vst.msk [vmem:[%s3435_s28 + $0x24] sm:$0x1] %vm1323_vm6, %v1465_v50 }
 0x34d   : > { %v1371_v41 = vpop.permute.xlu1 %1370  ;;  %1679 = vrot.lane.b32.xlu0 %v1626_v7, %s2790_s22 }
 0x34e   : > { %1391 = vst.msk [vmem:[%s3435_s28 + $0x31] sm:$0x1] %vm1323_vm6, %v1371_v41 }
 0x34f   : > { %v1469_v25 = vpop.permute.xlu0 %1468  ;;  %2142 = vrot.lane.b32.xlu1 %v2107_v20, %s2794_s30 }
 0x350   : > { %1488 = vst.msk [vmem:[%s3435_s28 + $0x44] sm:$0x1] %vm1323_vm6, %v1469_v25 }
 0x351   : > { %1691 = vrot.lane.b32.xlu0 %v1650_v61, %s2790_s22  ;;  %v1375_v14 = vpop.permute.xlu1 %1374 }
 0x352   : > { %1393 = vst.msk [vmem:[%s3435_s28 + $0x51] sm:$0x1] %vm1323_vm6, %v1375_v14 }
 0x353   : > { %v1497_v30 = vpop.permute.xlu0 %1496  ;;  %1975 = vrot.lane.b32.xlu1 %v3582_v42, %s2793_s29 }
 0x354   : > { %1518 = vst.msk [vmem:[%s3435_s28 + $0x25] sm:$0x1] %vm1323_vm6, %v1497_v30 }
 0x355   : > { %1695 = vrot.lane.b32.xlu0 %v1658_v51, %s2790_s22  ;;  %v1403_v7 = vpop.permute.xlu1 %1402 }
 0x356   : > { %1423 = vst.msk [vmem:[%s3435_s28 + $0x32] sm:$0x1] %vm1323_vm6, %v1403_v7 }
 0x357   : > { %v1501_v32 = vpop.permute.xlu0 %1500  ;;  %1979 = vrot.lane.b32.xlu1 %v3585_v44, %s2793_s29 }
 0x358   : > { %1520 = vst.msk [vmem:[%s3435_s28 + $0x45] sm:$0x1] %vm1323_vm6, %v1501_v32 }
 0x359   : > { %1821 = vrot.lane.b32.xlu0 %v3636_v33, %s2787_s19  ;;  %v1407_v42 = vpop.permute.xlu1 %1406 }
 0x35a   : > { %1425 = vst.msk [vmem:[%s3435_s28 + $0x52] sm:$0x1] %vm1323_vm6, %v1407_v42 }
 0x35b   : > { %v1529_v46 = vpop.permute.xlu0 %1528  ;;  %1378 = vrot.lane.b32.xlu1 %v3639_v43, %s2777_s8  ;;  %s2300_s8 = sshll.u32 %s3435_s28, 4  ;;  %s4267_s8 = int_to_ptr.vmem [resolvable:$true] %s2300_s8 }
 0x35c   : > { %1550 = vst.msk [vmem:[%s3435_s28 + $0x26] sm:$0x1] %vm1323_vm6, %v1529_v46 }
 0x35d   : > { %1853 = vrot.lane.b32.xlu0 %v3636_v33, %s2788_s23  ;;  %v1435_v34 = vpop.permute.xlu1 %1434 }
 0x35e   : > { %1455 = vst.msk [vmem:[%s3435_s28 + $0x33] sm:$0x1] %vm1323_vm6, %v1435_v34 }
 0x35f   : > { %v1533_v44 = vpop.permute.xlu0 %1532  ;;  %1410 = vrot.lane.b32.xlu1 %v3639_v43, %s2776_s7  ;;  %s2421_s7 = sshll.u32 %s2839_s16, 11  ;;  %s2795_s16 = smov [#allocation6]  }
 0x360   : > { %1552 = vst.msk [vmem:[%s3435_s28 + $0x46] sm:$0x1] %vm1323_vm6, %v1533_v44 }
 0x361   : > { %1885 = vrot.lane.b32.xlu0 %v3636_v33, %s2789_s20  ;;  %v1439_v61 = vpop.permute.xlu1 %1438 }
 0x362   : > { %1457 = vst.msk [vmem:[%s3435_s28 + $0x53] sm:$0x1] %vm1323_vm6, %v1439_v61 }
 0x363   : > { %v1672_v51 = vpop.permute.xlu0 %1671  ;;  %1442 = vrot.lane.b32.xlu1 %v3639_v43, %s2783_s9  ;;  %s4265_s9 = scalar_lea.hbm %s4316_s3, %s2421_s7 }
 0x364   : > { %v1704_v19 = vsel %vm1703_vm7, %v1672_v51, %v3866_v15 }
 0x365   : > { %1720 = vst.msk [vmem:[%s3435_s28 + $0x7] sm:$0x1] %vm1323_vm6, %v1704_v19  ;;  %1917 = vrot.lane.b32.xlu0 %v3636_v33, %s2791_s26  ;;  %v1467_v20 = vpop.permute.xlu1 %1466 }
 0x366   : > { %1487 = vst.msk [vmem:[%s3435_s28 + $0x34] sm:$0x1] %vm1323_vm6, %v1467_v20 }
 0x367   : > { %v1688_v59 = vpop.permute.xlu0 %1687  ;;  %1474 = vrot.lane.b32.xlu1 %v3639_v43, %s2784_s4  ;;  %s2287_s4 = scalar_lea.sflag [#allocation5], %s2922_s5 }
 0x368   : > { %v1708_v47 = vsel %vm1703_vm7, %v1688_v59, %v3876_v16 }
 0x369   : > { %1724 = vst.msk [vmem:[%s3435_s28 + $0x47] sm:$0x1] %vm1323_vm6, %v1708_v47  ;;  %1949 = vrot.lane.b32.xlu0 %v3636_v33, %s2792_s27  ;;  %v1471_v39 = vpop.permute.xlu1 %1470 }
 0x36a   : > { %1489 = vst.msk [vmem:[%s3435_s28 + $0x54] sm:$0x1] %vm1323_vm6, %v1471_v39 }
 0x36b   : > { %v1814_v62 = vpop.permute.xlu0 %1813  ;;  %1506 = vrot.lane.b32.xlu1 %v3639_v43, %s2785_s6  ;;  %s2686_s6 = scalar_lea.vmem %s4267_s8, 2048 }
 0x36c   : > { %1835 = vst.msk [vmem:[%s3435_s28 + $0x28] sm:$0x1] %vm1323_vm6, %v1814_v62  ;;  %p2687_p11 = scmp.ne.s32.totalorder %s4267_s8, %s2686_s6 }
 0x36d   : > { %2120 = vrot.lane.b32.xlu0 %v2063_v54, %s2794_s30  ;;  %v1499_v9 = vpop.permute.xlu1 %1498 }
 0x36e   : > { %1519 = vst.msk [vmem:[%s3435_s28 + $0x35] sm:$0x1] %vm1323_vm6, %v1499_v9  ;;  %p2688_p13 = pnand %p2687_p11, %p4325_p12 }
 0x36f   : > { %v1818_v15 = vpop.permute.xlu0 %1817  ;;  %1538 = vrot.lane.b32.xlu1 %v3639_v43, %s2786_s17  ;;  %s2690_s17 = sshll.u32 %s2795_s16, 4  ;;  %s2691_s17 = int_to_ptr.vmem [resolvable:$false] %s2690_s17 }
 0x370   : > { %1837 = vst.msk [vmem:[%s3435_s28 + $0x48] sm:$0x1] %vm1323_vm6, %v1818_v15  ;;  %p2689_p8 = pneg %p2688_p13  ;;  %p2693_p10 = scmp.lt.s32.totalorder %s4267_s8, %s2691_s17 }
 0x371   : > { %2124 = vrot.lane.b32.xlu0 %v2071_v55, %s2794_s30  ;;  %v1503_v27 = vpop.permute.xlu1 %1502 }
 0x372   : > { %1521 = vst.msk [vmem:[%s3435_s28 + $0x55] sm:$0x1] %vm1323_vm6, %v1503_v27 }
 0x373   : > { %v1846_v45 = vpop.permute.xlu0 %1845  ;;  %1685 = vrot.lane.b32.xlu1 %v1638_v63, %s2790_s22 }
 0x374   : > { %1867 = vst.msk [vmem:[%s3435_s28 + $0x29] sm:$0x1] %vm1323_vm6, %v1846_v45 }
 0x375   : > { %2136 = vrot.lane.b32.xlu0 %v2095_v56, %s2794_s30  ;;  %v1531_v5 = vpop.permute.xlu1 %1530 }
 0x376   : > { %1551 = vst.msk [vmem:[%s3435_s28 + $0x36] sm:$0x1] %vm1323_vm6, %v1531_v5 }
 0x377   : > { %v1850_v54 = vpop.permute.xlu0 %1849  ;;  %1701 = vrot.lane.b32.xlu1 %v1670_v13, %s2790_s22 }
 0x378   : > { %1869 = vst.msk [vmem:[%s3435_s28 + $0x49] sm:$0x1] %vm1323_vm6, %v1850_v54 }
 0x379   : > { %2140 = vrot.lane.b32.xlu0 %v2103_v60, %s2794_s30  ;;  %v1535_v48 = vpop.permute.xlu1 %1534 }
 0x37a   : > { %1553 = vst.msk [vmem:[%s3435_s28 + $0x56] sm:$0x1] %vm1323_vm6, %v1535_v48 }
 0x37b   : > { %v1878_v55 = vpop.permute.xlu0 %1877  ;;  %1823 = vrot.lane.b32.xlu1 %v3673_v8, %s2787_s19  ;;  %s2692_s19 = scalar_lea.vmem %s2691_s17, 4096 }
 0x37c   : > { %1899 = vst.msk [vmem:[%s3435_s28 + $0x2a] sm:$0x1] %vm1323_vm6, %v1878_v55  ;;  %p2694_p0 = scmp.lt.s32.totalorder %s2692_s19, %s2686_s6 }
 0x37d   : > { %1981 = vrot.lane.b32.xlu0 %v3636_v33, %s2793_s29  ;;  %v4078_v56 = vpop.permute.xlu1 %1677  ;;  %v4324_v33 = vrot.slane %v3645_v22, %v3410_v57 }
 0x37e   : > { %p2695_p2 = por %p2694_p0, %p2693_p10 }
 0x37f   : > { %v1882_v43 = vpop.permute.xlu0 %1881  ;;  %1855 = vrot.lane.b32.xlu1 %v3673_v8, %s2788_s23 }
 0x380   : > { %1901 = vst.msk [vmem:[%s3435_s28 + $0x4a] sm:$0x1] %vm1323_vm6, %v1882_v43  ;;  %p2696_p4 = pnand %p2695_p2, %p2689_p8 }
 0x381   : > { %1683 = vrot.lane.b32.xlu0 %v4323_v49, %s2790_s22  ;;  %v4088_v60 = vpop.permute.xlu1 %1681 }
 0x383   : > { %v1910_v63 = vpop.permute.xlu0 %1909  ;;  %1887 = vrot.lane.b32.xlu1 %v3673_v8, %s2789_s20 }
 0x384   : > { %1931 = vst.msk [vmem:[%s3435_s28 + $0x2b] sm:$0x1] %vm1323_vm6, %v1910_v63 }
 0x385   : > { %1699 = vrot.lane.b32.xlu0 %v4324_v33, %s2790_s22  ;;  %v4098_v13 = vpop.permute.xlu1 %1693 }
 0x387   : > { %v1914_v16 = vpop.permute.xlu0 %1913  ;;  %1919 = vrot.lane.b32.xlu1 %v3673_v8, %s2791_s26 }
 0x388   : > { %1933 = vst.msk [vmem:[%s3435_s28 + $0x4b] sm:$0x1] %vm1323_vm6, %v1914_v16 }
 0x389   : > { %2128 = vrot.lane.b32.xlu0 %v2079_v52, %s2794_s30  ;;  %v4108_v58 = vpop.permute.xlu1 %1697 }
 0x38b   : > { %v1942_v37 = vpop.permute.xlu0 %1941  ;;  %1951 = vrot.lane.b32.xlu1 %v3673_v8, %s2792_s27 }
 0x38c   : > { %1963 = vst.msk [vmem:[%s3435_s28 + $0x2c] sm:$0x1] %vm1323_vm6, %v1942_v37 }
 0x38d   : > { %2144 = vrot.lane.b32.xlu0 %v2111_v2, %s2794_s30  ;;  %v1816_v22 = vpop.permute.xlu1 %1815 }
 0x38e   : > { %1836 = vst.msk [vmem:[%s3435_s28 + $0x38] sm:$0x1] %vm1323_vm6, %v1816_v22 }
 0x38f   : > { %v1946_v23 = vpop.permute.xlu0 %1945  ;;  %2130 = vrot.lane.b32.xlu1 %v2083_v53, %s2794_s30 }
 0x390   : > { %1965 = vst.msk [vmem:[%s3435_s28 + $0x4c] sm:$0x1] %vm1323_vm6, %v1946_v23 }
 0x391   : > { %2266 = vrot.lane.b32.xlu0 %v3668_v36, %s2782_s11  ;;  %v1820_v52 = vpop.permute.xlu1 %1819 }
 0x392   : > { %1838 = vst.msk [vmem:[%s3435_s28 + $0x58] sm:$0x1] %vm1323_vm6, %v1820_v52 }
 0x393   : > { %v2117_v57 = vpop.permute.xlu0 %2116  ;;  %2146 = vrot.lane.b32.xlu1 %v2115_v18, %s2794_s30 }
 0x394   : > { %v2149_v2 = vsel %vm2148_vm8, %v2117_v57, %v3934_v35 }
 0x395   : > { %2165 = vst.msk [vmem:[%s3435_s28 + $0xe] sm:$0x1] %vm1323_vm6, %v2149_v2  ;;  %v1848_v12 = vpop.permute.xlu1 %1847 }
 0x396   : > { %1868 = vst.msk [vmem:[%s3435_s28 + $0x39] sm:$0x1] %vm1323_vm6, %v1848_v12 }
 0x397   : > { %v2133_v36 = vpop.permute.xlu0 %2132  ;;  %1983 = vrot.lane.b32.xlu1 %v3673_v8, %s2793_s29 }
 0x398   : > { %v2153_v38 = vsel %vm2148_vm8, %v2133_v36, %v3944_v29 }
 0x399   : > { %2169 = vst.msk [vmem:[%s3435_s28 + $0x4e] sm:$0x1] %vm1323_vm6, %v2153_v38  ;;  %v1852_v31 = vpop.permute.xlu1 %1851 }
 0x39a   : > { %1870 = vst.msk [vmem:[%s3435_s28 + $0x59] sm:$0x1] %vm1323_vm6, %v1852_v31 }
 0x39b   : > { %v1974_v53 = vpop.permute.xlu0 %1973  ;;  %2268 = vrot.lane.b32.xlu1 %v3680_v28, %s2782_s11 }
 0x39c   : > { %1995 = vst.msk [vmem:[%s3435_s28 + $0x2d] sm:$0x1] %vm1323_vm6, %v1974_v53 }
 0x39d   : > { %v1880_v18 = vpop.permute.xlu1 %1879 }
 0x39e   : > { %1900 = vst.msk [vmem:[%s3435_s28 + $0x3a] sm:$0x1] %vm1323_vm6, %v1880_v18 }
 0x39f   : > { %v1978_v8 = vpop.permute.xlu0 %1977 }
 0x3a0   : > { %1997 = vst.msk [vmem:[%s3435_s28 + $0x4d] sm:$0x1] %vm1323_vm6, %v1978_v8 }
 0x3a1   : > { %v1884_v40 = vpop.permute.xlu1 %1883 }
 0x3a2   : > { %1902 = vst.msk [vmem:[%s3435_s28 + $0x5a] sm:$0x1] %vm1323_vm6, %v1884_v40 }
 0x3a3   : > { %v1377_v11 = vpop.permute.xlu0 %1376 }
 0x3a4   : > { %1394 = vst.msk [vmem:[%s3435_s28 + $0x61] sm:$0x1] %vm1323_vm6, %v1377_v11 }
 0x3a5   : > { %v1912_v28 = vpop.permute.xlu1 %1911 }
 0x3a6   : > { %1932 = vst.msk [vmem:[%s3435_s28 + $0x3b] sm:$0x1] %vm1323_vm6, %v1912_v28 }
 0x3a7   : > { %v1409_v26 = vpop.permute.xlu0 %1408 }
 0x3a8   : > { %1426 = vst.msk [vmem:[%s3435_s28 + $0x62] sm:$0x1] %vm1323_vm6, %v1409_v26 }
 0x3a9   : > { %v1916_v24 = vpop.permute.xlu1 %1915 }
 0x3aa   : > { %1934 = vst.msk [vmem:[%s3435_s28 + $0x5b] sm:$0x1] %vm1323_vm6, %v1916_v24 }
 0x3ab   : > { %v1441_v0 = vpop.permute.xlu0 %1440 }
 0x3ac   : > { %1458 = vst.msk [vmem:[%s3435_s28 + $0x63] sm:$0x1] %vm1323_vm6, %v1441_v0 }
 0x3ad   : > { %v1944_v10 = vpop.permute.xlu1 %1943 }
 0x3ae   : > { %1964 = vst.msk [vmem:[%s3435_s28 + $0x3c] sm:$0x1] %vm1323_vm6, %v1944_v10 }
 0x3af   : > { %v1473_v3 = vpop.permute.xlu0 %1472 }
 0x3b0   : > { %1490 = vst.msk [vmem:[%s3435_s28 + $0x64] sm:$0x1] %vm1323_vm6, %v1473_v3 }
 0x3b1   : > { %v1948_v6 = vpop.permute.xlu1 %1947 }
 0x3b2   : > { %1966 = vst.msk [vmem:[%s3435_s28 + $0x5c] sm:$0x1] %vm1323_vm6, %v1948_v6 }
 0x3b3   : > { %v1505_v4 = vpop.permute.xlu0 %1504 }
 0x3b4   : > { %1522 = vst.msk [vmem:[%s3435_s28 + $0x65] sm:$0x1] %vm1323_vm6, %v1505_v4 }
 0x3b5   : > { %v2123_v21 = vpop.permute.xlu1 %2122 }
 0x3b7   : > { %v1537_v1 = vpop.permute.xlu0 %1536 }
 0x3b8   : > { %1554 = vst.msk [vmem:[%s3435_s28 + $0x66] sm:$0x1] %vm1323_vm6, %v1537_v1 }
 0x3b9   : > { %v2127_v35 = vpop.permute.xlu1 %2126 }
 0x3bb   : > { %v1676_v17 = vpop.permute.xlu0 %1675 }
 0x3bc   : > { %v1705_v29 = vsel %vm1703_vm7, %v1676_v17, %v4078_v56 }
 0x3bd   : > { %1721 = vst.msk [vmem:[%s3435_s28 + $0x17] sm:$0x1] %vm1323_vm6, %v1705_v29  ;;  %v2139_v50 = vpop.permute.xlu1 %2138 }
 0x3bf   : > { %v1680_v41 = vpop.permute.xlu0 %1679 }
 0x3c0   : > { %v1706_v25 = vsel %vm1703_vm7, %v1680_v41, %v4088_v60 }
 0x3c1   : > { %1722 = vst.msk [vmem:[%s3435_s28 + $0x27] sm:$0x1] %vm1323_vm6, %v1706_v25  ;;  %v2143_v14 = vpop.permute.xlu1 %2142 }
 0x3c3   : > { %v1692_v30 = vpop.permute.xlu0 %1691 }
 0x3c4   : > { %v1709_v7 = vsel %vm1703_vm7, %v1692_v30, %v4098_v13 }
 0x3c5   : > { %1725 = vst.msk [vmem:[%s3435_s28 + $0x57] sm:$0x1] %vm1323_vm6, %v1709_v7  ;;  %v1976_v32 = vpop.permute.xlu1 %1975 }
 0x3c6   : > { %1996 = vst.msk [vmem:[%s3435_s28 + $0x3d] sm:$0x1] %vm1323_vm6, %v1976_v32 }
 0x3c7   : > { %v1696_v42 = vpop.permute.xlu0 %1695 }
 0x3c8   : > { %v1710_v46 = vsel %vm1703_vm7, %v1696_v42, %v4108_v58 }
 0x3c9   : > { %1726 = vst.msk [vmem:[%s3435_s28 + $0x67] sm:$0x1] %vm1323_vm6, %v1710_v46  ;;  %v1980_v34 = vpop.permute.xlu1 %1979 }
 0x3ca   : > { %1998 = vst.msk [vmem:[%s3435_s28 + $0x5d] sm:$0x1] %vm1323_vm6, %v1980_v34 }
 0x3cb   : > { %v1822_v44 = vpop.permute.xlu0 %1821 }
 0x3cc   : > { %1839 = vst.msk [vmem:[%s3435_s28 + $0x68] sm:$0x1] %vm1323_vm6, %v1822_v44 }
 0x3cd   : > { %v1379_v61 = vpop.permute.xlu1 %1378 }
 0x3ce   : > { %1395 = vst.msk [vmem:[%s3435_s28 + $0x71] sm:$0x1] %vm1323_vm6, %v1379_v61 }
 0x3cf   : > { %v1854_v51 = vpop.permute.xlu0 %1853 }
 0x3d0   : > { %1871 = vst.msk [vmem:[%s3435_s28 + $0x69] sm:$0x1] %vm1323_vm6, %v1854_v51 }
 0x3d1   : > { %v1411_v19 = vpop.permute.xlu1 %1410 }
 0x3d2   : > { %1427 = vst.msk [vmem:[%s3435_s28 + $0x72] sm:$0x1] %vm1323_vm6, %v1411_v19 }
 0x3d3   : > { %v1886_v20 = vpop.permute.xlu0 %1885 }
 0x3d4   : > { %1903 = vst.msk [vmem:[%s3435_s28 + $0x6a] sm:$0x1] %vm1323_vm6, %v1886_v20 }
 0x3d5   : > { %v1443_v59 = vpop.permute.xlu1 %1442 }
 0x3d6   : > { %1459 = vst.msk [vmem:[%s3435_s28 + $0x73] sm:$0x1] %vm1323_vm6, %v1443_v59 }
 0x3d7   : > { %v1918_v47 = vpop.permute.xlu0 %1917 }
 0x3d8   : > { %1935 = vst.msk [vmem:[%s3435_s28 + $0x6b] sm:$0x1] %vm1323_vm6, %v1918_v47 }
 0x3d9   : > { %v1475_v39 = vpop.permute.xlu1 %1474 }
 0x3da   : > { %1491 = vst.msk [vmem:[%s3435_s28 + $0x74] sm:$0x1] %vm1323_vm6, %v1475_v39 }
 0x3db   : > { %v1950_v62 = vpop.permute.xlu0 %1949 }
 0x3dc   : > { %1967 = vst.msk [vmem:[%s3435_s28 + $0x6c] sm:$0x1] %vm1323_vm6, %v1950_v62 }
 0x3dd   : > { %v1507_v9 = vpop.permute.xlu1 %1506 }
 0x3de   : > { %1523 = vst.msk [vmem:[%s3435_s28 + $0x75] sm:$0x1] %vm1323_vm6, %v1507_v9 }
 0x3df   : > { %v2121_v15 = vpop.permute.xlu0 %2120 }
 0x3e0   : > { %v2150_v27 = vsel %vm2148_vm8, %v2121_v15, %v2123_v21 }
 0x3e1   : > { %2166 = vst.msk [vmem:[%s3435_s28 + $0x1e] sm:$0x1] %vm1323_vm6, %v2150_v27  ;;  %v1539_v45 = vpop.permute.xlu1 %1538 }
 0x3e2   : > { %1555 = vst.msk [vmem:[%s3435_s28 + $0x76] sm:$0x1] %vm1323_vm6, %v1539_v45 }
 0x3e3   : > { %v2125_v5 = vpop.permute.xlu0 %2124 }
 0x3e4   : > { %v2151_v54 = vsel %vm2148_vm8, %v2125_v5, %v2127_v35 }
 0x3e5   : > { %2167 = vst.msk [vmem:[%s3435_s28 + $0x2e] sm:$0x1] %vm1323_vm6, %v2151_v54  ;;  %v1686_v48 = vpop.permute.xlu1 %1685 }
 0x3e7   : > { %v2137_v55 = vpop.permute.xlu0 %2136 }
 0x3e8   : > { %v2154_v56 = vsel %vm2148_vm8, %v2137_v55, %v2139_v50 }
 0x3e9   : > { %2170 = vst.msk [vmem:[%s3435_s28 + $0x5e] sm:$0x1] %vm1323_vm6, %v2154_v56  ;;  %v1702_v43 = vpop.permute.xlu1 %1701 }
 0x3eb   : > { %v2141_v49 = vpop.permute.xlu0 %2140 }
 0x3ec   : > { %v2155_v60 = vsel %vm2148_vm8, %v2141_v49, %v2143_v14 }
 0x3ed   : > { %2171 = vst.msk [vmem:[%s3435_s28 + $0x6e] sm:$0x1] %vm1323_vm6, %v2155_v60  ;;  %v1824_v63 = vpop.permute.xlu1 %1823 }
 0x3ee   : > { %1840 = vst.msk [vmem:[%s3435_s28 + $0x78] sm:$0x1] %vm1323_vm6, %v1824_v63 }
 0x3ef   : > { %v1982_v33 = vpop.permute.xlu0 %1981 }
 0x3f0   : > { %1999 = vst.msk [vmem:[%s3435_s28 + $0x6d] sm:$0x1] %vm1323_vm6, %v1982_v33 }
 0x3f1   : > { %v1856_v13 = vpop.permute.xlu1 %1855 }
 0x3f2   : > { %1872 = vst.msk [vmem:[%s3435_s28 + $0x79] sm:$0x1] %vm1323_vm6, %v1856_v13 }
 0x3f3   : > { %v1684_v16 = vpop.permute.xlu0 %1683 }
 0x3f4   : > { %v1707_v58 = vsel %vm1703_vm7, %v1684_v16, %v1686_v48 }
 0x3f5   : > { %1723 = vst.msk [vmem:[%s3435_s28 + $0x37] sm:$0x1] %vm1323_vm6, %v1707_v58  ;;  %v1888_v37 = vpop.permute.xlu1 %1887 }
 0x3f6   : > { %1904 = vst.msk [vmem:[%s3435_s28 + $0x7a] sm:$0x1] %vm1323_vm6, %v1888_v37 }
 0x3f7   : > { %v1700_v22 = vpop.permute.xlu0 %1699 }
 0x3f8   : > { %v1711_v23 = vsel %vm1703_vm7, %v1700_v22, %v1702_v43 }
 0x3f9   : > { %1727 = vst.msk [vmem:[%s3435_s28 + $0x77] sm:$0x1] %vm1323_vm6, %v1711_v23  ;;  %v1920_v52 = vpop.permute.xlu1 %1919 }
 0x3fa   : > { %1936 = vst.msk [vmem:[%s3435_s28 + $0x7b] sm:$0x1] %vm1323_vm6, %v1920_v52 }
 0x3fb   : > { %v2129_v57 = vpop.permute.xlu0 %2128 }
 0x3fd   : > { %v1952_v2 = vpop.permute.xlu1 %1951 }
 0x3fe   : > { %1968 = vst.msk [vmem:[%s3435_s28 + $0x7c] sm:$0x1] %vm1323_vm6, %v1952_v2 }
 0x3ff   : > { %v2145_v12 = vpop.permute.xlu0 %2144 }
 0x401   : > { %v2131_v36 = vpop.permute.xlu1 %2130 }
 0x402   : > { %v2152_v38 = vsel %vm2148_vm8, %v2129_v57, %v2131_v36 }
 0x403   : > { %2168 = vst.msk [vmem:[%s3435_s28 + $0x3e] sm:$0x1] %vm1323_vm6, %v2152_v38  ;;  %v2267_v31 = vpop.permute.xlu0 %2266 }
 0x404   : > { %2284 = vst.msk [vmem:[%s3435_s28 + $0x6f] sm:$0x1] %vm1323_vm6, %v2267_v31 }
 0x405   : > { %v2147_v53 = vpop.permute.xlu1 %2146 }
 0x406   : > { %v2156_v18 = vsel %vm2148_vm8, %v2145_v12, %v2147_v53 }
 0x407   : > { %2172 = vst.msk [vmem:[%s3435_s28 + $0x7e] sm:$0x1] %vm1323_vm6, %v2156_v18 }
 0x409   : > { %v1984_v8 = vpop.permute.xlu1 %1983 }
 0x40a   : > { %2000 = vst.msk [vmem:[%s3435_s28 + $0x7d] sm:$0x1] %vm1323_vm6, %v1984_v8 }
 0x40d   : > { %v2269_v40 = vpop.permute.xlu1 %2268 }
 0x40e   : > { %2285 = vst.msk [vmem:[%s3435_s28 + $0x7f] sm:$0x1] %vm1323_vm6, %v2269_v40 }
 0x40f   : > { %2699 = shalt.err (!%p2696_p4)
}
 0x410   : > { %s2700_s28 = scalar_lea.hbm %s4265_s9, 2048  ;;  %s2704_s22 = scalar_lea.hbm %s4316_s3, 4096 }
 0x411   : > { %p2701_p5 = scmp.ne.s32.totalorder %s4265_s9, %s2700_s28  ;;  %p2705_p1 = scmp.lt.u32.totalorder %s4265_s9, %s4316_s3 }
 0x412   : > { %p2706_p3 = scmp.lt.u32.totalorder %s2704_s22, %s2700_s28  ;;  %p2708_p11 = scmp.lt.u32.totalorder %s2700_s28, %s4265_s9 }
 0x413   : > { %p2702_p7 = pnand %p2701_p5, %p4325_p12 }
 0x414   : > { %p2707_p6 = por %p2706_p3, %p2705_p1 }
 0x415   : > { %p2703_p9 = pneg %p2702_p7 }
 0x416   : > { %p2709_p13 = por %p2708_p11, %p2707_p6 }
 0x418   : > { %p2710_p8 = pnand %p2709_p13, %p2703_p9 }
 0x41a   : > { %2713 = shalt.err (!%p2710_p8)
}
 0x41b   : > { %s2796_s29 = smov 128   ;;  %s2797_s30 = smov 8  }
 0x41c   : > { %2452 = dma.vmem_to_hbm [thread:$0]  (%p4325_p12), %s4267_s8, 2048, %s4265_s9, %s2287_s4, %s2796_s29, %s2796_s29, %s2797_s30  }
 0x41d PF: > { %s2315_s7 = sand.u32 1, %s2740_s12   ;;  %p4326_p10 = scmp.ne.s32.totalorder %s4321_s25, 0 }
 0x41e   : > { %p4327_p0 = scmp.ge.s32.totalorder %s2752_s15, 2  ;;  %s2316_s10 = scalar_lea.sflag [#allocation5], %s2315_s7 }
 0x420   : > { %p2459_p2 = pnand %p4327_p0, %p4326_p10 }
 0x422   : > { %2735 = dma.done.wait (!%p2459_p2), %s2316_s10, 2048  }
 0x423   : > { %2737 = vsyncadd (!%p2459_p2), %s2316_s10, 4294965248  ;;  %p16_p4 = scmp.ge.s32.totalorder %s2843_s18, 4   ;;  %s4328_s12 = smov %s2744_s13 }
 0x424   : > { %s4329_s13 = smov %s2748_s14  ;;  %s4330_s14 = smov %s2855_s21 }
 0x425   : > { %s4331_s15 = smov %s2843_s18  ;;  %18 = sbr.rel (!%p16_p4) target bundleno = 5 (0x5), region = 83 }
 0x42c   :  { %2321 = vsyncpa [#allocation4], 1 }
 0x42d   :  { %2323 = vsyncpa [#allocation4 + $0x1], 1 }
 0x42e   :  { %2324 = vsyncpa [#allocation5], 1 }
 0x42f   :  { %2326 = vsyncpa [#allocation5 + $0x1], 1 }

</bundles_post_ra>
